<compile_context>
chip_gen: v7x
topology: tpu7x:2x2x1
jax: 0.10.0
libtpu: 0.0.40
codegen_flags: <defaults>
</compile_context>

<pallas_src>
import jax
import jax.numpy as jnp
from jax import lax
from jax.experimental import pallas as pl
from jax.experimental.pallas import tpu as pltpu

ENERGY_STD = 0.1062
CUTOFF = 3.0          # Angstrom (plays the role of args.cutoff)
N_RBF = 8


def _round_up(x, m):
    return ((x + m - 1) // m) * m


def _se3_kernel(m_ref, sft_ref, ld2_ref, rd2_ref, post_ref, site_ref,
                params_ref, cg_ref, cgm_ref, out_ref):
    """One (row-tile, col-tile) block of the pair matrix; accumulates into the
    lane-dense (4, TM) output block across the column axis."""
    i = pl.program_id(0)          # row tile  (atoms owning the output lanes)
    j = pl.program_id(1)          # col tile  (neighbour atoms, reduction axis)
    tm = m_ref.shape[0]
    tn = sft_ref.shape[1]

    cutoff2 = params_ref[0]
    cutoff = params_ref[1]
    gamma = params_ref[2]
    tgd = params_ref[3]           # 2 * gamma * delta_mu

    # Pair coupling c_ij = h_i.h_j (K=4) and squared distances d2 (K=5),
    # both on the otherwise-idle MXU.
    c = jnp.dot(m_ref[...], sft_ref[...], preferred_element_type=jnp.float32)
    d2 = jnp.dot(ld2_ref[...], rd2_ref[...], preferred_element_type=jnp.float32)

    # Radius-graph adjacency fused into one select.  Self-pairs are excluded
    # by global atom index (the Gram-matrix diagonal is only ~0 in fp32).
    row_ids = i * tm + lax.broadcasted_iota(jnp.int32, (tm, tn), 0)
    col_ids = j * tn + lax.broadcasted_iota(jnp.int32, (tm, tn), 1)
    base = jnp.where((row_ids != col_ids) & (d2 < cutoff2), c, 0.0)

    d2c = jnp.maximum(d2, 1e-12)
    inv_d = lax.rsqrt(d2c)                       # one EUP op
    d_rbf = jnp.minimum(d2c * inv_d, cutoff)     # clamped distance (masked anyway)
    e0 = jnp.exp(-gamma * jnp.minimum(d2c, cutoff2))
    b = jnp.exp(tgd * d_rbf)

    # Gaussian RBF sums via Horner on the degree-(N_RBF-1) polynomials in b:
    #   g(d)  = e0 * sum_k cg_k  b^k ,   gm(d) = e0 * sum_k cgm_k b^k
    pg = cg_ref[N_RBF - 1]
    pgm = cgm_ref[N_RBF - 1]
    for k in range(N_RBF - 2, -1, -1):           # unrolled; SMEM scalar coeffs
        pg = pg * b + cg_ref[k]
        pgm = pgm * b + cgm_ref[k]
    g = e0 * pg                                  # sum_k w_k exp(-gamma(d-mu_k)^2)
    gm = e0 * pgm

    pair_e = base * g                                        # pair energies
    coeff = base * ((-2.0 * gamma) * (d_rbf * g - gm)) * inv_d   # force kernel

    # Row reductions on the MXU.  rd2 rows 0..2 = -2*pos^T, row 3 = ones, so
    # red[0:3] = -2 * sum_j coeff_ij r_j and red[3] = sum_j coeff_ij.
    dn = (((1,), (1,)), ((), ()))
    red = lax.dot_general(rd2_ref[0:4, :], coeff, dn,
                          preferred_element_type=jnp.float32)      # (4, TM)
    e_row = lax.dot_general(rd2_ref[3:4, :], pair_e, dn,
                            preferred_element_type=jnp.float32)    # (1, TM)

    # F_i = -2*ES*(r_i * rowsum - contr)  ==  -ES*(2*r_i*red[3] + red[0:3])
    f_contrib = (-ENERGY_STD) * (2.0 * post_ref[...] * red[3:4, :] + red[0:3, :])
    e_contrib = ENERGY_STD * e_row

    @pl.when(j == 0)
    def _init():
        out_ref[0:3, :] = f_contrib
        out_ref[3:4, :] = e_contrib + ENERGY_STD * site_ref[...]

    @pl.when(j > 0)
    def _accumulate():
        out_ref[0:3, :] = out_ref[0:3, :] + f_contrib
        out_ref[3:4, :] = out_ref[3:4, :] + e_contrib


def se3_forward(species_idx, positions, params, cutoff=CUTOFF, forces=True):
    """Mirrors SE3Module.forward: returns (energy_scalar, forces) or energy."""
    w_emb, w_atom, rbf_mu, rbf_w = params
    n = positions.shape[0]

    # ---- tiny O(N) precompute outside the kernel ---------------------------
    species_oh = jnp.eye(4, dtype=jnp.float32)[species_idx]       # torch.eye(4)
    coupling = w_emb @ w_emb.T                                    # (4, 4)
    m = species_oh @ coupling                                     # (N, 4)
    site = (species_oh @ w_atom).reshape(1, n)                    # (1, N)
    pos = positions.astype(jnp.float32)
    # Center positions: distances are invariant, and the Gram-matrix d^2 stays
    # well-conditioned in fp32.
    pos = pos - jnp.mean(pos, axis=0, keepdims=True)

    cutoff_v = jnp.float32(cutoff)
    cutoff2 = cutoff_v * cutoff_v
    gamma = jnp.float32(N_RBF) / cutoff2
    dmu = rbf_mu[1] - rbf_mu[0]            # RBF centers are a uniform linspace
    scalar_params = jnp.stack(
        [cutoff2, cutoff_v, gamma, 2.0 * gamma * dmu]).astype(jnp.float32)
    c_g = (rbf_w * jnp.exp(-gamma * rbf_mu * rbf_mu)).astype(jnp.float32)
    c_gm = (c_g * rbf_mu).astype(jnp.float32)

    # Gram-matrix operands for d2 = |r_i|^2 + |r_j|^2 - 2 r_i.r_j
    sq = jnp.sum(pos * pos, axis=1)                               # (N,)
    ones_col = jnp.ones((n, 1), jnp.float32)
    lhs_d2 = jnp.concatenate([pos, sq[:, None], ones_col], axis=1)          # (N, 5)
    rhs_d2 = jnp.concatenate([-2.0 * pos.T, ones_col.T, sq[None, :]], axis=0)  # (5, N)

    # ---- tiling: 128-aligned lanes, row tiles x column tiles ----------------
    npad = _round_up(max(n, 1), 128)
    if npad <= 128:
        tm = npad
    elif npad == 256:
        tm = 128                      # >=2 row tiles for megacore sharding
    elif npad % 256 == 0:
        tm = 256
    else:
        tm = 128
    if npad <= 512:
        tn = npad
    elif npad % 512 == 0:
        tn = 512
    elif npad % 256 == 0:
        tn = 256
    else:
        tn = 128
    pad_n = npad - n

    # Padded atoms have zero species one-hot -> c = 0 gates every pair term.
    m_p = jnp.pad(m, ((0, pad_n), (0, 0)))                   # (NP, 4)
    sft_p = jnp.pad(species_oh, ((0, pad_n), (0, 0))).T      # (4, NP)
    lhs_p = jnp.pad(lhs_d2, ((0, pad_n), (0, 0)))            # (NP, 5)
    rhs_p = jnp.pad(rhs_d2, ((0, 0), (0, pad_n)))            # (5, NP)
    post_p = jnp.pad(pos.T, ((0, 0), (0, pad_n)))            # (3, NP)
    site_p = jnp.pad(site, ((0, 0), (0, pad_n)))             # (1, NP)

    # VMEM limit derived from the chip (v7x 64 MiB vs v5e/v6e 128 MiB).
    try:
        vmem_cap = int(pltpu.get_tpu_info().vmem_capacity_bytes)
    except Exception:
        vmem_cap = 64 * 1024 * 1024
    vmem_limit = int(min(100 * 1024 * 1024,
                         max(vmem_cap - 24 * 1024 * 1024, 32 * 1024 * 1024)))

    cost = pl.CostEstimate(
        flops=int(100 * npad * npad),
        transcendentals=int(3 * npad * npad),
        bytes_accessed=int(4 * npad * (4 + 4 + 5 + 5 + 3 + 1 + 4)))

    out = pl.pallas_call(
        _se3_kernel,
        grid=(npad // tm, npad // tn),
        in_specs=[
            pl.BlockSpec((tm, 4), lambda i, j: (i, 0)),      # coupling rows
            pl.BlockSpec((4, tn), lambda i, j: (0, j)),      # species^T cols
            pl.BlockSpec((tm, 5), lambda i, j: (i, 0)),      # [pos,|pos|^2,1] rows
            pl.BlockSpec((5, tn), lambda i, j: (0, j)),      # [-2 pos^T;1;|pos|^2] cols
            pl.BlockSpec((3, tm), lambda i, j: (0, i)),      # pos^T for the row tile
            pl.BlockSpec((1, tm), lambda i, j: (0, i)),      # per-atom site energies
            pl.BlockSpec(memory_space=pltpu.MemorySpace.SMEM),   # scalar params
            pl.BlockSpec(memory_space=pltpu.MemorySpace.SMEM),   # RBF coeffs
            pl.BlockSpec(memory_space=pltpu.MemorySpace.SMEM),   # RBF coeffs * mu
        ],
        out_specs=pl.BlockSpec((4, tm), lambda i, j: (0, i)),
        out_shape=jax.ShapeDtypeStruct((4, npad), jnp.float32),
        compiler_params=pltpu.CompilerParams(
            dimension_semantics=("parallel", "arbitrary"),
            vmem_limit_bytes=vmem_limit),
        cost_estimate=cost,
    )(m_p, sft_p, lhs_p, rhs_p, post_p, site_p, scalar_params, c_g, c_gm)

    energy_scalar = jnp.sum(out[3, :])      # padded lanes contribute exactly 0
    if forces:
        frc = out[:3, :n].T                 # (N, 3); lane-dense inside kernel
        return energy_scalar, frc
    return energy_scalar


if __name__ == "__main__":
    key = jax.random.PRNGKey(0)
    k_pos, k_emb, k_atom, k_rbf = jax.random.split(key, 4)

    # Small deterministic "molecule": 8 atoms, species from {H, C, N, O}.
    species = ['C', 'H', 'H', 'H', 'O', 'H', 'N', 'H']
    species_to_idx = {'H': 0, 'C': 1, 'N': 2, 'O': 3}   # matches eye[0..3]
    species_idx = jnp.array([species_to_idx[a] for a in species],
                            dtype=jnp.int32)

    n_atoms = len(species)
    positions = jax.random.normal(k_pos, (n_atoms, 3), dtype=jnp.float32) * 1.5

    hidden = 8
    w_emb = 0.1 * jax.random.normal(k_emb, (4, hidden), dtype=jnp.float32)
    w_atom = 0.1 * jax.random.normal(k_atom, (4, 1), dtype=jnp.float32)
    rbf_mu = jnp.linspace(0.0, CUTOFF, N_RBF, dtype=jnp.float32)
    rbf_w = 0.1 * jax.random.normal(k_rbf, (N_RBF,), dtype=jnp.float32)

    energy, forces = se3_forward(
        species_idx, positions, (w_emb, w_atom, rbf_mu, rbf_w), forces=True)
    jax.block_until_ready((energy, forces))
    print("KERNEL_OK")
</pallas_src>

<mosaic_0001>
module attributes {stable_mosaic.version = 11 : i64} {
  func.func @_se3_kernel(%arg0: i32, %arg1: i32, %arg2: memref<128x4xf32, #tpu.memory_space<vmem>>, %arg3: memref<4x128xf32, #tpu.memory_space<vmem>>, %arg4: memref<128x5xf32, #tpu.memory_space<vmem>>, %arg5: memref<5x128xf32, #tpu.memory_space<vmem>>, %arg6: memref<3x128xf32, #tpu.memory_space<vmem>>, %arg7: memref<1x128xf32, #tpu.memory_space<vmem>>, %arg8: memref<4xf32, #tpu.memory_space<smem>>, %arg9: memref<8xf32, #tpu.memory_space<smem>>, %arg10: memref<8xf32, #tpu.memory_space<smem>>, %arg11: memref<4x128xf32, #tpu.memory_space<vmem>>) attributes {dimension_semantics = [#tpu.dimension_semantics<parallel>, #tpu.dimension_semantics<arbitrary>], iteration_bounds = array<i64: 1, 1>, scalar_prefetch = 0 : i64, scratch_operands = 0 : i64, tpu.core_type = #tpu.core_type<tc>, window_params = [{transform_indices = @transform_0, window_bounds = array<i64: 128, 4>}, {transform_indices = @transform_1, window_bounds = array<i64: 4, 128>}, {transform_indices = @transform_2, window_bounds = array<i64: 128, 5>}, {transform_indices = @transform_3, window_bounds = array<i64: 5, 128>}, {transform_indices = @transform_4, window_bounds = array<i64: 3, 128>}, {transform_indices = @transform_5, window_bounds = array<i64: 1, 128>}, {transform_indices = @transform_6, window_bounds = array<i64: 4>}, {transform_indices = @transform_7, window_bounds = array<i64: 8>}, {transform_indices = @transform_8, window_bounds = array<i64: 8>}, {transform_indices = @transform_9, window_bounds = array<i64: 4, 128>}]} {
    %c0 = arith.constant 0 : index
    %0 = memref.load %arg8[%c0] : memref<4xf32, #tpu.memory_space<smem>>
    %c1 = arith.constant 1 : index
    %1 = memref.load %arg8[%c1] : memref<4xf32, #tpu.memory_space<smem>>
    %c2 = arith.constant 2 : index
    %2 = memref.load %arg8[%c2] : memref<4xf32, #tpu.memory_space<smem>>
    %c3 = arith.constant 3 : index
    %3 = memref.load %arg8[%c3] : memref<4xf32, #tpu.memory_space<smem>>
    %c0_0 = arith.constant 0 : index
    %c0_1 = arith.constant 0 : index
    %4 = vector.load %arg2[%c0_0, %c0_1] : memref<128x4xf32, #tpu.memory_space<vmem>>, vector<128x4xf32>
    %c0_2 = arith.constant 0 : index
    %c0_3 = arith.constant 0 : index
    %5 = vector.load %arg3[%c0_2, %c0_3] : memref<4x128xf32, #tpu.memory_space<vmem>>, vector<4x128xf32>
    %cst = arith.constant dense<0.000000e+00> : vector<128x128xf32>
    %6 = tpu.matmul %4, %5, %cst {dimension_numbers = #tpu.dot_dimension_numbers<[1], [0], [0], [1], [0, 0, 1, 1], [], []>} : vector<128x4xf32>, vector<4x128xf32>, vector<128x128xf32> -> vector<128x128xf32>
    %c0_4 = arith.constant 0 : index
    %c0_5 = arith.constant 0 : index
    %7 = vector.load %arg4[%c0_4, %c0_5] : memref<128x5xf32, #tpu.memory_space<vmem>>, vector<128x5xf32>
    %c0_6 = arith.constant 0 : index
    %c0_7 = arith.constant 0 : index
    %8 = vector.load %arg5[%c0_6, %c0_7] : memref<5x128xf32, #tpu.memory_space<vmem>>, vector<5x128xf32>
    %cst_8 = arith.constant dense<0.000000e+00> : vector<128x128xf32>
    %9 = tpu.matmul %7, %8, %cst_8 {dimension_numbers = #tpu.dot_dimension_numbers<[1], [0], [0], [1], [0, 0, 1, 1], [], []>} : vector<128x5xf32>, vector<5x128xf32>, vector<128x128xf32> -> vector<128x128xf32>
    %c128_i32 = arith.constant 128 : i32
    %10 = arith.muli %arg0, %c128_i32 : i32
    %11 = tpu.iota {dimensions = array<i32: 0>} : vector<128x128xi32>
    %12 = vector.broadcast %10 : i32 to vector<128x128xi32>
    %13 = arith.addi %12, %11 : vector<128x128xi32>
    %c128_i32_9 = arith.constant 128 : i32
    %14 = arith.muli %arg1, %c128_i32_9 : i32
    %15 = tpu.iota {dimensions = array<i32: 1>} : vector<128x128xi32>
    %16 = vector.broadcast %14 : i32 to vector<128x128xi32>
    %17 = arith.addi %16, %15 : vector<128x128xi32>
    %18 = arith.cmpi ne, %13, %17 : vector<128x128xi32>
    %19 = vector.broadcast %0 : f32 to vector<128x128xf32>
    %20 = arith.cmpf olt, %9, %19 : vector<128x128xf32>
    %21 = arith.andi %18, %20 : vector<128x128xi1>
    %cst_10 = arith.constant 0.000000e+00 : f32
    %22 = vector.broadcast %cst_10 : f32 to vector<128x128xf32>
    %23 = arith.select %21, %6, %22 : vector<128x128xi1>, vector<128x128xf32>
    %cst_11 = arith.constant 9.99999996E-13 : f32
    %24 = vector.broadcast %cst_11 : f32 to vector<128x128xf32>
    %25 = arith.maximumf %9, %24 : vector<128x128xf32>
    %26 = math.rsqrt %25 : vector<128x128xf32>
    %27 = arith.mulf %25, %26 : vector<128x128xf32>
    %28 = vector.broadcast %1 : f32 to vector<128x128xf32>
    %29 = arith.minimumf %27, %28 : vector<128x128xf32>
    %cst_12 = arith.constant 0.000000e+00 : f32
    %30 = arith.subf %cst_12, %2 : f32
    %31 = vector.broadcast %0 : f32 to vector<128x128xf32>
    %32 = arith.minimumf %25, %31 : vector<128x128xf32>
    %33 = vector.broadcast %30 : f32 to vector<128x128xf32>
    %34 = arith.mulf %33, %32 : vector<128x128xf32>
    %35 = math.exp %34 : vector<128x128xf32>
    %36 = vector.broadcast %3 : f32 to vector<128x128xf32>
    %37 = arith.mulf %36, %29 : vector<128x128xf32>
    %38 = math.exp %37 : vector<128x128xf32>
    %c7 = arith.constant 7 : index
    %39 = memref.load %arg9[%c7] : memref<8xf32, #tpu.memory_space<smem>>
    %c7_13 = arith.constant 7 : index
    %40 = memref.load %arg10[%c7_13] : memref<8xf32, #tpu.memory_space<smem>>
    %41 = vector.broadcast %39 : f32 to vector<128x128xf32>
    %42 = arith.mulf %41, %38 : vector<128x128xf32>
    %c6 = arith.constant 6 : index
    %43 = memref.load %arg9[%c6] : memref<8xf32, #tpu.memory_space<smem>>
    %44 = vector.broadcast %43 : f32 to vector<128x128xf32>
    %45 = arith.addf %42, %44 : vector<128x128xf32>
    %46 = vector.broadcast %40 : f32 to vector<128x128xf32>
    %47 = arith.mulf %46, %38 : vector<128x128xf32>
    %c6_14 = arith.constant 6 : index
    %48 = memref.load %arg10[%c6_14] : memref<8xf32, #tpu.memory_space<smem>>
    %49 = vector.broadcast %48 : f32 to vector<128x128xf32>
    %50 = arith.addf %47, %49 : vector<128x128xf32>
    %51 = arith.mulf %45, %38 : vector<128x128xf32>
    %c5 = arith.constant 5 : index
    %52 = memref.load %arg9[%c5] : memref<8xf32, #tpu.memory_space<smem>>
    %53 = vector.broadcast %52 : f32 to vector<128x128xf32>
    %54 = arith.addf %51, %53 : vector<128x128xf32>
    %55 = arith.mulf %50, %38 : vector<128x128xf32>
    %c5_15 = arith.constant 5 : index
    %56 = memref.load %arg10[%c5_15] : memref<8xf32, #tpu.memory_space<smem>>
    %57 = vector.broadcast %56 : f32 to vector<128x128xf32>
    %58 = arith.addf %55, %57 : vector<128x128xf32>
    %59 = arith.mulf %54, %38 : vector<128x128xf32>
    %c4 = arith.constant 4 : index
    %60 = memref.load %arg9[%c4] : memref<8xf32, #tpu.memory_space<smem>>
    %61 = vector.broadcast %60 : f32 to vector<128x128xf32>
    %62 = arith.addf %59, %61 : vector<128x128xf32>
    %63 = arith.mulf %58, %38 : vector<128x128xf32>
    %c4_16 = arith.constant 4 : index
    %64 = memref.load %arg10[%c4_16] : memref<8xf32, #tpu.memory_space<smem>>
    %65 = vector.broadcast %64 : f32 to vector<128x128xf32>
    %66 = arith.addf %63, %65 : vector<128x128xf32>
    %67 = arith.mulf %62, %38 : vector<128x128xf32>
    %c3_17 = arith.constant 3 : index
    %68 = memref.load %arg9[%c3_17] : memref<8xf32, #tpu.memory_space<smem>>
    %69 = vector.broadcast %68 : f32 to vector<128x128xf32>
    %70 = arith.addf %67, %69 : vector<128x128xf32>
    %71 = arith.mulf %66, %38 : vector<128x128xf32>
    %c3_18 = arith.constant 3 : index
    %72 = memref.load %arg10[%c3_18] : memref<8xf32, #tpu.memory_space<smem>>
    %73 = vector.broadcast %72 : f32 to vector<128x128xf32>
    %74 = arith.addf %71, %73 : vector<128x128xf32>
    %75 = arith.mulf %70, %38 : vector<128x128xf32>
    %c2_19 = arith.constant 2 : index
    %76 = memref.load %arg9[%c2_19] : memref<8xf32, #tpu.memory_space<smem>>
    %77 = vector.broadcast %76 : f32 to vector<128x128xf32>
    %78 = arith.addf %75, %77 : vector<128x128xf32>
    %79 = arith.mulf %74, %38 : vector<128x128xf32>
    %c2_20 = arith.constant 2 : index
    %80 = memref.load %arg10[%c2_20] : memref<8xf32, #tpu.memory_space<smem>>
    %81 = vector.broadcast %80 : f32 to vector<128x128xf32>
    %82 = arith.addf %79, %81 : vector<128x128xf32>
    %83 = arith.mulf %78, %38 : vector<128x128xf32>
    %c1_21 = arith.constant 1 : index
    %84 = memref.load %arg9[%c1_21] : memref<8xf32, #tpu.memory_space<smem>>
    %85 = vector.broadcast %84 : f32 to vector<128x128xf32>
    %86 = arith.addf %83, %85 : vector<128x128xf32>
    %87 = arith.mulf %82, %38 : vector<128x128xf32>
    %c1_22 = arith.constant 1 : index
    %88 = memref.load %arg10[%c1_22] : memref<8xf32, #tpu.memory_space<smem>>
    %89 = vector.broadcast %88 : f32 to vector<128x128xf32>
    %90 = arith.addf %87, %89 : vector<128x128xf32>
    %91 = arith.mulf %86, %38 : vector<128x128xf32>
    %c0_23 = arith.constant 0 : index
    %92 = memref.load %arg9[%c0_23] : memref<8xf32, #tpu.memory_space<smem>>
    %93 = vector.broadcast %92 : f32 to vector<128x128xf32>
    %94 = arith.addf %91, %93 : vector<128x128xf32>
    %95 = arith.mulf %90, %38 : vector<128x128xf32>
    %c0_24 = arith.constant 0 : index
    %96 = memref.load %arg10[%c0_24] : memref<8xf32, #tpu.memory_space<smem>>
    %97 = vector.broadcast %96 : f32 to vector<128x128xf32>
    %98 = arith.addf %95, %97 : vector<128x128xf32>
    %99 = arith.mulf %35, %94 : vector<128x128xf32>
    %100 = arith.mulf %35, %98 : vector<128x128xf32>
    %101 = arith.mulf %23, %99 : vector<128x128xf32>
    %cst_25 = arith.constant -2.000000e+00 : f32
    %102 = arith.mulf %cst_25, %2 : f32
    %103 = arith.mulf %29, %99 : vector<128x128xf32>
    %104 = arith.subf %103, %100 : vector<128x128xf32>
    %105 = vector.broadcast %102 : f32 to vector<128x128xf32>
    %106 = arith.mulf %105, %104 : vector<128x128xf32>
    %107 = arith.mulf %23, %106 : vector<128x128xf32>
    %108 = arith.mulf %107, %26 : vector<128x128xf32>
    %c0_26 = arith.constant 0 : index
    %c0_27 = arith.constant 0 : index
    %109 = vector.load %arg5[%c0_26, %c0_27] : memref<5x128xf32, #tpu.memory_space<vmem>>, vector<4x128xf32>
    %cst_28 = arith.constant dense<0.000000e+00> : vector<4x128xf32>
    %110 = tpu.matmul %109, %108, %cst_28 {dimension_numbers = #tpu.dot_dimension_numbers<[1], [1], [0], [0], [0, 0, 1, 0], [], []>} : vector<4x128xf32>, vector<128x128xf32>, vector<4x128xf32> -> vector<4x128xf32>
    %c3_29 = arith.constant 3 : index
    %c0_30 = arith.constant 0 : index
    %111 = vector.load %arg5[%c3_29, %c0_30] : memref<5x128xf32, #tpu.memory_space<vmem>>, vector<1x128xf32>
    %cst_31 = arith.constant dense<0.000000e+00> : vector<1x128xf32>
    %112 = tpu.matmul %111, %101, %cst_31 {dimension_numbers = #tpu.dot_dimension_numbers<[1], [1], [0], [0], [0, 0, 1, 0], [], []>} : vector<1x128xf32>, vector<128x128xf32>, vector<1x128xf32> -> vector<1x128xf32>
    %c0_32 = arith.constant 0 : index
    %c0_33 = arith.constant 0 : index
    %113 = vector.load %arg6[%c0_32, %c0_33] : memref<3x128xf32, #tpu.memory_space<vmem>>, vector<3x128xf32>
    %cst_34 = arith.constant 2.000000e+00 : f32
    %114 = vector.broadcast %cst_34 : f32 to vector<3x128xf32>
    %115 = arith.mulf %114, %113 : vector<3x128xf32>
    %116 = vector.extract_strided_slice %110 {offsets = [3, 0], sizes = [1, 128], strides = [1, 1]} : vector<4x128xf32> to vector<1x128xf32>
    %117 = vector.broadcast %116 : vector<1x128xf32> to vector<3x128xf32>
    %118 = arith.mulf %115, %117 : vector<3x128xf32>
    %119 = vector.extract_strided_slice %110 {offsets = [0, 0], sizes = [3, 128], strides = [1, 1]} : vector<4x128xf32> to vector<3x128xf32>
    %120 = arith.addf %118, %119 : vector<3x128xf32>
    %cst_35 = arith.constant -1.062000e-01 : f32
    %121 = vector.broadcast %cst_35 : f32 to vector<3x128xf32>
    %122 = arith.mulf %121, %120 : vector<3x128xf32>
    %cst_36 = arith.constant 1.062000e-01 : f32
    %123 = vector.broadcast %cst_36 : f32 to vector<1x128xf32>
    %124 = arith.mulf %123, %112 : vector<1x128xf32>
    %c0_i32 = arith.constant 0 : i32
    %125 = arith.cmpi eq, %arg1, %c0_i32 : i32
    %126 = arith.extui %125 : i1 to i32
    %c0_i32_37 = arith.constant 0 : i32
    %127 = arith.cmpi ne, %126, %c0_i32_37 : i32
    scf.if %127 {
      %c0_40 = arith.constant 0 : index
      %c0_41 = arith.constant 0 : index
      %131 = vector.load %arg11[%c0_40, %c0_41] : memref<4x128xf32, #tpu.memory_space<vmem>>, vector<3x128xf32>
      tpu.vector_store %arg11[%c0_40, %c0_41], %122 {strides = array<i32>} : memref<4x128xf32, #tpu.memory_space<vmem>>, vector<3x128xf32>,
      %c0_42 = arith.constant 0 : index
      %c0_43 = arith.constant 0 : index
      %132 = vector.load %arg7[%c0_42, %c0_43] : memref<1x128xf32, #tpu.memory_space<vmem>>, vector<1x128xf32>
      %cst_44 = arith.constant 1.062000e-01 : f32
      %133 = vector.broadcast %cst_44 : f32 to vector<1x128xf32>
      %134 = arith.mulf %133, %132 : vector<1x128xf32>
      %135 = arith.addf %124, %134 : vector<1x128xf32>
      %c3_45 = arith.constant 3 : index
      %c0_46 = arith.constant 0 : index
      %136 = vector.load %arg11[%c3_45, %c0_46] : memref<4x128xf32, #tpu.memory_space<vmem>>, vector<1x128xf32>
      tpu.vector_store %arg11[%c3_45, %c0_46], %135 {strides = array<i32>} : memref<4x128xf32, #tpu.memory_space<vmem>>, vector<1x128xf32>,
    } else {
    }
    %c0_i32_38 = arith.constant 0 : i32
    %128 = arith.cmpi sgt, %arg1, %c0_i32_38 : i32
    %129 = arith.extui %128 : i1 to i32
    %c0_i32_39 = arith.constant 0 : i32
    %130 = arith.cmpi ne, %129, %c0_i32_39 : i32
    scf.if %130 {
      %c0_40 = arith.constant 0 : index
      %c0_41 = arith.constant 0 : index
      %131 = vector.load %arg11[%c0_40, %c0_41] : memref<4x128xf32, #tpu.memory_space<vmem>>, vector<3x128xf32>
      %132 = arith.addf %131, %122 : vector<3x128xf32>
      %c0_42 = arith.constant 0 : index
      %c0_43 = arith.constant 0 : index
      %133 = vector.load %arg11[%c0_42, %c0_43] : memref<4x128xf32, #tpu.memory_space<vmem>>, vector<3x128xf32>
      tpu.vector_store %arg11[%c0_42, %c0_43], %132 {strides = array<i32>} : memref<4x128xf32, #tpu.memory_space<vmem>>, vector<3x128xf32>,
      %c3_44 = arith.constant 3 : index
      %c0_45 = arith.constant 0 : index
      %134 = vector.load %arg11[%c3_44, %c0_45] : memref<4x128xf32, #tpu.memory_space<vmem>>, vector<1x128xf32>
      %135 = arith.addf %134, %124 : vector<1x128xf32>
      %c3_46 = arith.constant 3 : index
      %c0_47 = arith.constant 0 : index
      %136 = vector.load %arg11[%c3_46, %c0_47] : memref<4x128xf32, #tpu.memory_space<vmem>>, vector<1x128xf32>
      tpu.vector_store %arg11[%c3_46, %c0_47], %135 {strides = array<i32>} : memref<4x128xf32, #tpu.memory_space<vmem>>, vector<1x128xf32>,
    } else {
    }
    return
  }
  func.func @transform_0(%arg0: i32, %arg1: i32) -> (i32, i32) {
    %c0_i32 = arith.constant 0 : i32
    %c0_i32_0 = arith.constant 0 : i32
    return %arg0, %c0_i32 : i32, i32
  }
  func.func @transform_1(%arg0: i32, %arg1: i32) -> (i32, i32) {
    %c0_i32 = arith.constant 0 : i32
    %c0_i32_0 = arith.constant 0 : i32
    return %c0_i32, %arg1 : i32, i32
  }
  func.func @transform_2(%arg0: i32, %arg1: i32) -> (i32, i32) {
    %c0_i32 = arith.constant 0 : i32
    %c0_i32_0 = arith.constant 0 : i32
    return %arg0, %c0_i32 : i32, i32
  }
  func.func @transform_3(%arg0: i32, %arg1: i32) -> (i32, i32) {
    %c0_i32 = arith.constant 0 : i32
    %c0_i32_0 = arith.constant 0 : i32
    return %c0_i32, %arg1 : i32, i32
  }
  func.func @transform_4(%arg0: i32, %arg1: i32) -> (i32, i32) {
    %c0_i32 = arith.constant 0 : i32
    %c0_i32_0 = arith.constant 0 : i32
    return %c0_i32, %arg0 : i32, i32
  }
  func.func @transform_5(%arg0: i32, %arg1: i32) -> (i32, i32) {
    %c0_i32 = arith.constant 0 : i32
    %c0_i32_0 = arith.constant 0 : i32
    return %c0_i32, %arg0 : i32, i32
  }
  func.func @transform_6(%arg0: i32, %arg1: i32) -> i32 {
    %c0_i32 = arith.constant 0 : i32
    %c0_i32_0 = arith.constant 0 : i32
    return %c0_i32 : i32
  }
  func.func @transform_7(%arg0: i32, %arg1: i32) -> i32 {
    %c0_i32 = arith.constant 0 : i32
    %c0_i32_0 = arith.constant 0 : i32
    return %c0_i32 : i32
  }
  func.func @transform_8(%arg0: i32, %arg1: i32) -> i32 {
    %c0_i32 = arith.constant 0 : i32
    %c0_i32_0 = arith.constant 0 : i32
    return %c0_i32 : i32
  }
  func.func @transform_9(%arg0: i32, %arg1: i32) -> (i32, i32) {
    %c0_i32 = arith.constant 0 : i32
    %c0_i32_0 = arith.constant 0 : i32
    return %c0_i32, %arg0 : i32, i32
  }
}

</mosaic_0001>

<bundles_post_ra>
// kernel: tpu_custom_call.1
= control target key start
LH: loop header
LB: loop body
LE: loop exit
PB: predicated region body
PF: predicated region fallthrough
CT: control target
= control target key end

     0   :  { %14 = vsyncpa [#allocation4], 0  ;;  %s3627_s0 = inlined_call_operand.vmem [shape: f32[128,4], index: 0, kind: input, shape index: {}]   ;;  %s3628_s1 = inlined_call_operand.vmem [shape: f32[4,128], index: 1, kind: input, shape index: {}]   ;;  %s3629_s2 = inlined_call_operand.vmem [shape: f32[128,5], index: 2, kind: input, shape index: {}]   ;;  %s3630_s3 = inlined_call_operand.vmem [shape: f32[5,128], index: 3, kind: input, shape index: {}]   ;;  %s3631_s4 = inlined_call_operand.vmem [shape: f32[3,128], index: 4, kind: input, shape index: {}]   ;;  %s3632_s5 = inlined_call_operand.vmem [shape: f32[1,128], index: 5, kind: input, shape index: {}]   ;;  %s3633_s6 = inlined_call_operand.vmem [shape: f32[4], index: 6, kind: input, shape index: {}]   ;;  %s3634_s7 = inlined_call_operand.vmem [shape: f32[8], index: 7, kind: input, shape index: {}]   ;;  %s3635_s8 = inlined_call_operand.vmem [shape: f32[8], index: 8, kind: input, shape index: {}]   ;;  %s3636_s9 = inlined_call_operand.hbm [shape: f32[4,128], index: 9, kind: output, shape index: {}]  }
   0x1   :  { %15 = vsyncpa [#allocation6], 0  ;;  %s45_s11 = sshll.u32 %s3634_s7, 4  ;;  %s46_s11 = int_to_ptr.vmem [resolvable:$true] %s45_s11 }
   0x2   :  { %16 = vsyncpa [#allocation3], 0  ;;  %s35_s14 = sshll.u32 %s3633_s6, 4  ;;  %s1977_s15 = scalar_lea.vmem %s46_s11, 16  ;;  %s36_s14 = int_to_ptr.vmem [resolvable:$true] %s35_s14 }
   0x3   :  { %p1978_p0 = scmp.ne.s32.totalorder %s46_s11, %s1977_s15  ;;  %p1982_p1 = scmp.lt.s32.totalorder %s46_s11, %s46_s11 }
   0x4   :  { %p1983_p2 = scmp.lt.s32.totalorder %s1977_s15, %s1977_s15 }
   0x6   :  { %p1984_p3 = por %p1983_p2, %p1982_p1 }
   0x8   :  { %p1985_p4 = pnand %p1984_p3, %p1978_p0 }
   0xa   :  { %1988 = shalt.err (!%p1985_p4)
}
   0xb   :  { %s2041_s16 = smov [#allocation5]   ;;  %s1989_s17 = scalar_lea.vmem %s36_s14, 16 }
   0xc   :  { %48 = dma.vmem_to_smem %s46_s11, 16, %s2041_s16, [#allocation6]  }
   0xd   :  { %p1990_p5 = scmp.ne.s32.totalorder %s36_s14, %s1989_s17  ;;  %p1994_p6 = scmp.lt.s32.totalorder %s36_s14, %s36_s14 }
   0xe   :  { %p1995_p7 = scmp.lt.s32.totalorder %s1989_s17, %s1989_s17 }
  0x10   :  { %p1996_p8 = por %p1995_p7, %p1994_p6 }
  0x12   :  { %p1997_p9 = pnand %p1996_p8, %p1990_p5 }
  0x14   :  { %2000 = shalt.err (!%p1997_p9)
}
  0x15   :  { %s2042_s7 = smov [#allocation2]   ;;  %s55_s19 = sshll.u32 %s3635_s8, 4  ;;  %s56_s19 = int_to_ptr.vmem [resolvable:$true] %s55_s19 }
  0x16   :  { %38 = dma.vmem_to_smem %s36_s14, 16, %s2042_s7, [#allocation4]  }
  0x17   :  { %s2001_s20 = scalar_lea.vmem %s56_s19, 16  ;;  %p2006_p11 = scmp.lt.s32.totalorder %s56_s19, %s56_s19 }
  0x18   :  { %p2002_p10 = scmp.ne.s32.totalorder %s56_s19, %s2001_s20  ;;  %p2007_p12 = scmp.lt.s32.totalorder %s2001_s20, %s2001_s20 }
  0x1a   :  { %p2008_p13 = por %p2007_p12, %p2006_p11 }
  0x1c   :  { %p2009_p0 = pnand %p2008_p13, %p2002_p10 }
  0x1e   :  { %2012 = shalt.err (!%p2009_p0)
}
  0x1f   :  { %s2043_s21 = smov [#allocation7]  }
  0x20   :  { %58 = dma.vmem_to_smem %s56_s19, 16, %s2043_s21, [#allocation6]  }
  0x21   :  { %2035 = dma.done.wait [#allocation4], 16  }
  0x22   :  { %2036 = vsyncadd [#allocation4], 4294967280 }
  0x23   :  { %2037 = dma.done.wait [#allocation6], 32  }
  0x24   :  { %2038 = vsyncadd [#allocation6], 4294967264 }
  0x25   :  { %68 = sfence }
  0x26   :  { %v304_v0 = vld [vmem:[%s3630_s3] sm:$0x1f]  ;;  %vm354_vm0 = vcmask 1044480   ;;  %vm305_vm1 = vcmask 39936   ;;  %vm139_vm2 = vcmask 1043456   ;;  %v289_v3 = vld [vmem:[%s3629_s2 + $0x8] sm:$0xff]  ;;  %v504_v34 = vlaneseq }
  0x27   :  { %v288_v1 = vld [vmem:[%s3629_s2] sm:$0xff]  ;;  %1730 = vmatprep.subr.msk.mxu1 %vm354_vm0, %v304_v0  ;;  %vm90_vm3 = vcmask 31744   ;;  %v74_v5 = vld [vmem:[%s3627_s0 + $0x8] sm:$0xff]  ;;  %v290_v6 = vld [vmem:[%s3629_s2 + $0x10] sm:$0xff]  ;;  %s2241_s17 = sld [smem:[#allocation2 + $0x2]]  ;;  %s69_s7 = sld [smem:[#allocation2]] }
  0x28   :  { %1732 = vmatprep.mubr.msk.f32.mxu1 %vm305_vm1, %v288_v1  ;;  %v89_v2 = vld [vmem:[%s3628_s1] sm:$0xf]  ;;  %1731 = vmatpush3.msk.msra.mxu1 %vm354_vm0, %v304_v0  ;;  %v75_v7 = vld [vmem:[%s3627_s0 + $0x10] sm:$0xff]  ;;  %v291_v8 = vld [vmem:[%s3629_s2 + $0x18] sm:$0xff]  ;;  %v2243_v35 = vshrl.u32 %v504_v34, 7  ;;  %s1587_s6 = sld [smem:[#allocation2 + $0x3]] }
  0x29   :  { %v73_v4 = vld [vmem:[%s3627_s0] sm:$0xff]  ;;  %1704 = vmatprep.subr.msk.mxu0 %vm139_vm2, %v89_v2  ;;  %1733 = vmatmul.mubr.msk.f32.vlgmr.msra.gmra.mrb[0].mxu1 %vm305_vm1, %v289_v3  ;;  %v76_v10 = vld [vmem:[%s3627_s0 + $0x18] sm:$0xff]  ;;  %v293_v12 = vld [vmem:[%s3629_s2 + $0x28] sm:$0xff]  ;;  %s1622_s18 = sld [smem:[#allocation5 + $0x7]]  ;;  %s1624_s20 = sld [smem:[#allocation5 + $0x6]]  ;;  %v2249_v37 = vand.u32 127, %v504_v34 }
  0x2a   :  { %1705 = vmatpush3.msk.msra.mxu0 %vm139_vm2, %v89_v2  ;;  %1706 = vmatprep.mubr.msk.f32.mxu0 %vm90_vm3, %v73_v4  ;;  %v292_v9 = vld [vmem:[%s3629_s2 + $0x20] sm:$0xff]  ;;  %v294_v13 = vld [vmem:[%s3629_s2 + $0x30] sm:$0xff]  ;;  %v78_v14 = vld [vmem:[%s3627_s0 + $0x28] sm:$0xff]  ;;  %3708 = vst [vmem:[#allocation12_spill] sm:$0xff] %v2243_v35  ;;  %s2245_s19 = sld [smem:[#allocation7 + $0x7]]  ;;  %v506_v36 = vadd.s32 8, %v2243_v35 }
  0x2b   :  { %1735 = vmatprep.mubr.msk.f32.mxu1 %vm305_vm1, %v290_v6  ;;  %1707 = vmatmul.mubr.msk.f32.vlgmr.msra.gmra.mrb[0].mxu0 %vm90_vm3, %v74_v5  ;;  %v77_v11 = vld [vmem:[%s3627_s0 + $0x20] sm:$0xff]  ;;  %v79_v15 = vld [vmem:[%s3627_s0 + $0x30] sm:$0xff]  ;;  %v295_v16 = vld [vmem:[%s3629_s2 + $0x38] sm:$0xff]  ;;  %v508_v38 = vadd.s32 24, %v2243_v35  ;;  %v507_v39 = vadd.s32 16, %v2243_v35  ;;  %s2253_s22 = sld [smem:[#allocation5 + $0x5]]  ;;  %vm543_vm5 = vcmp.ne.s32.totalorder %v2243_v35, %v2249_v37 }
  0x2c   :  { %1709 = vmatprep.mubr.msk.f32.mxu0 %vm90_vm3, %v75_v7  ;;  %v296_v17 = vld [vmem:[%s3629_s2 + $0x40] sm:$0xff]  ;;  %v80_v18 = vld [vmem:[%s3627_s0 + $0x38] sm:$0xff]  ;;  %v297_v20 = vld [vmem:[%s3629_s2 + $0x48] sm:$0xff]  ;;  %v2256_v40 = vadd.s32 40, %v2243_v35  ;;  %s2260_s23 = sld [smem:[#allocation7 + $0x5]]  ;;  %vm544_vm4 = vcmp.ne.s32.totalorder %v506_v36, %v2249_v37  ;;  %s2297_s8 = sld [smem:[#allocation5 + $0x4]] }
  0x2d   :  { %1736 = vmatmul.mubr.msk.f32.gmra.mrb[2].mxu1 %vm305_vm1, %v291_v8  ;;  %v81_v19 = vld [vmem:[%s3627_s0 + $0x40] sm:$0xff]  ;;  %v298_v21 = vld [vmem:[%s3629_s2 + $0x50] sm:$0xff]  ;;  %v82_v22 = vld [vmem:[%s3627_s0 + $0x48] sm:$0xff]  ;;  %s673_s21 = ssub.f32 0.0, %s2241_s17  ;;  %v2258_v41 = vstv %s69_s7  ;;  %vm546_vm6 = vcmp.ne.s32.totalorder %v508_v38, %v2249_v37  ;;  %vm545_vm7 = vcmp.ne.s32.totalorder %v507_v39, %v2249_v37  ;;  %s2305_s24 = sld [smem:[#allocation7 + $0x4]]  ;;  %v509_v60 = vadd.s32 32, %v2243_v35 }
  0x2e   :  { %1738 = vmatprep.mubr.msk.f32.mxu1 %vm305_vm1, %v292_v9  ;;  %v83_v23 = vld [vmem:[%s3627_s0 + $0x50] sm:$0xff]  ;;  %v299_v24 = vld [vmem:[%s3629_s2 + $0x58] sm:$0xff]  ;;  %v300_v25 = vld [vmem:[%s3629_s2 + $0x60] sm:$0xff]  ;;  %v2269_v45 = vstv %s1587_s6  ;;  %vm548_vm9 = vcmp.ne.s32.totalorder %v2256_v40, %v2249_v37  ;;  %s2313_s25 = sld [smem:[#allocation5 + $0x3]]  ;;  %v512_v0 = vadd.s32 56, %v2243_v35  ;;  %s2344_s27 = sld [smem:[#allocation5 + $0x2]] }
  0x2f   :  { %1710 = vmatmul.mubr.msk.f32.gmra.mrb[2].mxu0 %vm90_vm3, %v76_v10  ;;  %v84_v26 = vld [vmem:[%s3627_s0 + $0x58] sm:$0xff]  ;;  %v85_v27 = vld [vmem:[%s3627_s0 + $0x60] sm:$0xff]  ;;  %v301_v28 = vld [vmem:[%s3629_s2 + $0x68] sm:$0xff]  ;;  %v2262_v42 = vstv %s673_s21  ;;  %3710 = vst [vmem:[#allocation14_spill] sm:$0xff] %v2269_v45  ;;  %s2336_s26 = sld [smem:[#allocation7 + $0x3]]  ;;  %s2418_s28 = sld [smem:[#allocation7 + $0x2]] }
  0x30   :  { %1712 = vmatprep.mubr.msk.f32.mxu0 %vm90_vm3, %v77_v11  ;;  %v302_v29 = vld [vmem:[%s3629_s2 + $0x70] sm:$0xff]  ;;  %v86_v30 = vld [vmem:[%s3627_s0 + $0x68] sm:$0xff]  ;;  %v303_v32 = vld [vmem:[%s3629_s2 + $0x78] sm:$0xff]  ;;  %s1585_s2 = sld [smem:[#allocation2 + $0x1]]  ;;  %3709 = vst [vmem:[#allocation13_spill] sm:$0xff] %v2262_v42  ;;  %v2276_v48 = vstv %s1622_s18  ;;  %s2433_s10 = sld [smem:[#allocation5]] }
  0x31   :  { %1739 = vmatmul.mubr.msk.f32.gmra.mrb[4].mxu1 %vm305_vm1, %v293_v12  ;;  %v87_v31 = vld [vmem:[%s3627_s0 + $0x70] sm:$0xff]  ;;  %v88_v33 = vld [vmem:[%s3627_s0 + $0x78] sm:$0xff]  ;;  %s1625_s0 = sld [smem:[#allocation7 + $0x6]]  ;;  %v2285_v51 = vstv %s1624_s20  ;;  %v2288_v52 = vstv %s2245_s19  ;;  %s2420_s29 = sld [smem:[#allocation5 + $0x1]] }
  0x32   :  { %1741 = vmatprep.mubr.msk.f32.mxu1 %vm305_vm1, %v294_v13  ;;  %v2311_v61 = vstv %s2253_s22  ;;  %v2321_v2 = vstv %s2260_s23  ;;  %s2431_s30 = sld [smem:[#allocation7 + $0x1]]  ;;  %s2441_s11 = sld [smem:[#allocation7]] }
  0x33   :  { %1713 = vmatmul.mubr.msk.f32.gmra.mrb[4].mxu0 %vm90_vm3, %v78_v14  ;;  %s1316_s12 = smul.f32 -2.0, %s2241_s17 }
  0x34   :  { %1715 = vmatprep.mubr.msk.f32.mxu0 %vm90_vm3, %v79_v15 }
  0x35   :  { %1742 = vmatmul.mubr.msk.f32.gmra.mrb[6].mxu1 %vm305_vm1, %v295_v16 }
  0x36   :  { %1744 = vmatprep.mubr.msk.f32.mxu1 %vm305_vm1, %v296_v17  ;;  %v2267_v44 = vstv %s1585_s2 }
  0x37   :  { %1716 = vmatmul.mubr.msk.f32.gmra.mrb[6].mxu0 %vm90_vm3, %v80_v18  ;;  %v2295_v55 = vstv %s1625_s0 }
  0x38   :  { %1718 = vmatprep.mubr.msk.f32.mxu0 %vm90_vm3, %v81_v19 }
  0x39   :  { %1745 = vmatmul.mubr.msk.f32.gmra.mrb[8].mxu1 %vm305_vm1, %v297_v20 }
  0x3a   :  { %1747 = vmatprep.mubr.msk.f32.mxu1 %vm305_vm1, %v298_v21 }
  0x3b   :  { %1719 = vmatmul.mubr.msk.f32.gmra.mrb[8].mxu0 %vm90_vm3, %v82_v22 }
  0x3c   :  { %1721 = vmatprep.mubr.msk.f32.mxu0 %vm90_vm3, %v83_v23  ;;  %v2366_v23 = vstv %s2297_s8 }
  0x3d   :  { %1748 = vmatmul.mubr.msk.f32.gmra.mrb[10].mxu1 %vm305_vm1, %v299_v24 }
  0x3e   :  { %1750 = vmatprep.mubr.msk.f32.mxu1 %vm305_vm1, %v300_v25 }
  0x3f   :  { %1722 = vmatmul.mubr.msk.f32.gmra.mrb[10].mxu0 %vm90_vm3, %v84_v26 }
  0x40   :  { %1724 = vmatprep.mubr.msk.f32.mxu0 %vm90_vm3, %v85_v27 }
  0x41   :  { %1751 = vmatmul.mubr.msk.f32.gmra.mrb[12].mxu1 %vm305_vm1, %v301_v28  ;;  %v2376_v28 = vstv %s2305_s24 }
  0x42   :  { %1753 = vmatprep.mubr.msk.f32.mxu1 %vm305_vm1, %v302_v29  ;;  %3713 = vst [vmem:[#allocation17_spill] sm:$0xff] %v2376_v28  ;;  %v2379_v29 = vstv %s2313_s25 }
  0x43   :  { %1725 = vmatmul.mubr.msk.f32.gmra.mrb[12].mxu0 %vm90_vm3, %v86_v30 }
  0x44   :  { %1727 = vmatprep.mubr.msk.f32.mxu0 %vm90_vm3, %v87_v31 }
  0x45   :  { %1754 = vmatmul.mubr.msk.f32.gmra.mrb[14].mxu1 %vm305_vm1, %v303_v32  ;;  %vm547_vm1 = vcmp.ne.s32.totalorder %v509_v60, %v2249_v37  ;;  %v2416_v60 = vstv %s2344_s27 }
  0x47   :  { %1728 = vmatmul.mubr.msk.f32.gmra.mrb[14].mxu0 %vm90_vm3, %v88_v33  ;;  %vm550_vm3 = vcmp.ne.s32.totalorder %v512_v0, %v2249_v37 }
  0xfc   :  { %v1734_v43 = vpop.f32.mrb[0].mxu1 }
  0xfd   :  { %vm561_vm8 = vcmp.lt.f32.partialorder %v1734_v43, %v2258_v41  ;;  %v2274_v46 = vmax.f32 %v1734_v43, 1e-12  ;;  %v424_v47 = vpop.f32.mrb[1].mxu1 }
  0xfe   :  { %vm560_vm10 = vcmp.lt.f32.partialorder %v424_v47, %v2258_v41  ;;  %v2281_v49 = vmax.f32 %v424_v47, 1e-12  ;;  %v1708_v50 = vpop.f32.mrb[0].mxu0  ;;  %vm577_vm11 = vmand %vm544_vm4, %vm561_vm8 }
  0xff   :  { %1881 = vrsqrt.f32 %v2274_v46  ;;  %v675_v53 = vmin.f32 %v2274_v46, %v2258_v41  ;;  %v2293_v54 = vsel %vm577_vm11, %v1708_v50, 0.0  ;;  %v209_v56 = vpop.f32.mrb[1].mxu0  ;;  %vm576_vm12 = vmand %vm543_vm5, %vm560_vm10 }
 0x100   :  { %1883 = vrsqrt.f32 %v2281_v49  ;;  %v674_v57 = vmin.f32 %v2281_v49, %v2258_v41  ;;  %v2307_v58 = vsel %vm576_vm12, %v209_v56, 0.0  ;;  %v1737_v59 = vpop.f32.mrb[2].mxu1 }
 0x101   :  { %vm563_vm13 = vcmp.lt.f32.partialorder %v1737_v59, %v2258_v41  ;;  %v2316_v62 = vmax.f32 %v1737_v59, 1e-12  ;;  %v434_v63 = vpop.f32.mrb[3].mxu1  ;;  %v692_v1 = vmul.f32 %v2262_v42, %v675_v53  ;;  %v2413_v59 = vstv %s2336_s26 }
 0x102   :  { %vm562_vm14 = vcmp.lt.f32.partialorder %v434_v63, %v2258_v41  ;;  %v2324_v3 = vmax.f32 %v434_v63, 1e-12  ;;  %v1711_v4 = vpop.f32.mrb[2].mxu0  ;;  %vm579_vm15 = vmand %vm546_vm6, %vm563_vm13  ;;  %v691_v5 = vmul.f32 %v2262_v42, %v674_v57 }
 0x103   :  { %1885 = vrsqrt.f32 %v2316_v62  ;;  %v677_v6 = vmin.f32 %v2316_v62, %v2258_v41  ;;  %v2332_v7 = vsel %vm579_vm15, %v1711_v4, 0.0  ;;  %v219_v8 = vpop.f32.mrb[3].mxu0  ;;  %vm578_vm0 = vmand %vm545_vm7, %vm562_vm14  ;;  %v709_v15 = vmul.f32 1.442695, %v692_v1 }
 0x104   :  { %1887 = vrsqrt.f32 %v2324_v3  ;;  %v676_v9 = vmin.f32 %v2324_v3, %v2258_v41  ;;  %v1740_v10 = vpop.f32.mrb[4].mxu1  ;;  %v2341_v11 = vsel %vm578_vm0, %v219_v8, 0.0  ;;  %v707_v19 = vmul.f32 1.442695, %v691_v5 }
 0x105   :  { %v694_v12 = vmul.f32 %v2262_v42, %v677_v6  ;;  %vm565_vm2 = vcmp.lt.f32.partialorder %v1740_v10, %v2258_v41  ;;  %v2348_v13 = vmax.f32 %v1740_v10, 1e-12  ;;  %v444_v14 = vpop.f32.mrb[5].mxu1 }
 0x106   :  { %v693_v16 = vmul.f32 %v2262_v42, %v676_v9  ;;  %vm564_vm4 = vcmp.lt.f32.partialorder %v444_v14, %v2258_v41  ;;  %v2353_v17 = vmax.f32 %v444_v14, 1e-12  ;;  %v1714_v18 = vpop.f32.mrb[4].mxu0  ;;  %vm581_vm5 = vmand %vm548_vm9, %vm565_vm2 }
 0x107   :  { %1889 = vrsqrt.f32 %v2348_v13  ;;  %v679_v20 = vmin.f32 %v2348_v13, %v2258_v41  ;;  %v2361_v21 = vsel %vm581_vm5, %v1714_v18, 0.0  ;;  %v229_v22 = vpop.f32.mrb[5].mxu0  ;;  %vm580_vm6 = vmand %vm547_vm1, %vm564_vm4  ;;  %v713_v30 = vmul.f32 1.442695, %v694_v12 }
 0x108   :  { %3711 = vst [vmem:[#allocation15_spill] sm:$0xff] %v2361_v21  ;;  %1891 = vrsqrt.f32 %v2353_v17  ;;  %v678_v24 = vmin.f32 %v2353_v17, %v2258_v41  ;;  %v1743_v25 = vpop.f32.mrb[6].mxu1  ;;  %v2371_v26 = vsel %vm580_vm6, %v229_v22, 0.0  ;;  %v711_v34 = vmul.f32 1.442695, %v693_v16 }
 0x109   :  { %3712 = vst [vmem:[#allocation16_spill] sm:$0xff] %v2371_v26  ;;  %v2373_v27 = vpop.eup %1881  ;;  %vm567_vm7 = vcmp.lt.f32.partialorder %v1743_v25, %v2258_v41  ;;  %v2382_v31 = vpop.f32.mrb[7].mxu1  ;;  %1893 = vpow2.f32 %v709_v15  ;;  %v2388_v36 = vmax.f32 %v1743_v25, 1e-12  ;;  %v696_v40 = vmul.f32 %v2262_v42, %v679_v20 }
 0x10a   :  { %v2384_v32 = vpop.eup %1883  ;;  %v641_v33 = vmul.f32 %v2373_v27, %v2274_v46  ;;  %v1717_v38 = vpop.f32.mrb[6].mxu0  ;;  %vm583_vm8 = vmand %vm550_vm3, %vm567_vm7  ;;  %1895 = vpow2.f32 %v707_v19  ;;  %v695_v43 = vmul.f32 %v2262_v42, %v678_v24  ;;  %v2404_v53 = vmax.f32 %v2382_v31, 1e-12 }
 0x10b   :  { %v640_v39 = vmul.f32 %v2384_v32, %v2281_v49  ;;  %v2396_v47 = vpop.f32.mrb[7].mxu0  ;;  %v681_v50 = vmin.f32 %v2388_v36, %v2258_v41  ;;  %v2408_v57 = vsel %vm583_vm8, %v1717_v38, 0.0  ;;  %1897 = vpow2.f32 %v713_v30 }
 0x10c   :  { %3714 = vst [vmem:[#allocation18_spill] sm:$0xff] %v2396_v47  ;;  %v2399_v46 = vmin.f32 %v641_v33, %v2267_v44  ;;  %v2406_v56 = vpop.f32.mrb[8].mxu1  ;;  %3716 = vst [vmem:[#allocation20_spill] sm:$0xff] %v2408_v57  ;;  %1899 = vpow2.f32 %v711_v34  ;;  %v680_v6 = vmin.f32 %v2404_v53, %v2258_v41  ;;  %v717_v12 = vmul.f32 1.442695, %v696_v40 }
 0x10d   :  { %3715 = vst [vmem:[#allocation19_spill] sm:$0xff] %v2406_v56  ;;  %v2410_v49 = vpop.eup %1885  ;;  %v2423_v63 = vmin.f32 %v640_v39, %v2267_v44  ;;  %v2425_v0 = vpop.f32.mrb[9].mxu1  ;;  %1901 = vrsqrt.f32 %v2388_v36  ;;  %v715_v16 = vmul.f32 1.442695, %v695_v43  ;;  %v698_v18 = vmul.f32 %v2262_v42, %v681_v50 }
 0x10e   :  { %3717 = vst [vmem:[#allocation21_spill] sm:$0xff] %v2425_v0  ;;  %v2427_v1 = vpop.eup %1887  ;;  %v741_v4 = vmul.f32 %v2269_v45, %v2399_v46  ;;  %v643_v5 = vmul.f32 %v2410_v49, %v2316_v62  ;;  %v2439_v8 = vpop.f32.mrb[8].mxu0  ;;  %1903 = vrsqrt.f32 %v2404_v53  ;;  %v697_v38 = vmul.f32 %v2262_v42, %v680_v6 }
 0x10f   :  { %3718 = vst [vmem:[#allocation22_spill] sm:$0xff] %v2427_v1  ;;  %3719 = vst [vmem:[#allocation23_spill] sm:$0xff] %v2439_v8  ;;  %v740_v9 = vmul.f32 %v2269_v45, %v2423_v63  ;;  %v642_v10 = vmul.f32 %v2427_v1, %v2324_v3  ;;  %v2448_v14 = vpop.f32.mrb[9].mxu0  ;;  %v2463_v3 = vmax.f32 %v2406_v56, 1e-12  ;;  %v2557_v56 = vadd.s32 80, %v2243_v35 }
 0x110   :  { %3720 = vst [vmem:[#allocation24_spill] sm:$0xff] %v2448_v14  ;;  %v758_v62 = vmul.f32 1.442695, %v741_v4  ;;  %v2451_v15 = vmin.f32 %v643_v5, %v2267_v44  ;;  %v2454_v19 = vpop.f32.mrb[10].mxu1  ;;  %v721_v6 = vmul.f32 1.442695, %v698_v18  ;;  %v2525_v14 = vstv %s2433_s10 }
 0x111   :  { %3721 = vst [vmem:[#allocation25_spill] sm:$0xff] %v2454_v19  ;;  %v2456_v20 = vpop.eup %1889  ;;  %v756_v22 = vmul.f32 1.442695, %v740_v9  ;;  %v2459_v24 = vmin.f32 %v642_v10, %v2267_v44  ;;  %3723 = vst [vmem:[#allocation27_spill] sm:$0xff] %v2463_v3  ;;  %v2465_v25 = vpop.f32.mrb[11].mxu1  ;;  %v683_v50 = vmin.f32 %v2463_v3, %v2258_v41  ;;  %vm566_vm9 = vcmp.lt.f32.partialorder %v2382_v31, %v2258_v41 }
 0x112   :  { %3722 = vst [vmem:[#allocation26_spill] sm:$0xff] %v2456_v20  ;;  %3724 = vst [vmem:[#allocation28_spill] sm:$0xff] %v2465_v25  ;;  %v2467_v30 = vpop.eup %1891  ;;  %1905 = vpow2.f32 %v758_v62  ;;  %v645_v33 = vmul.f32 %v2456_v20, %v2348_v13  ;;  %v743_v34 = vmul.f32 %v2269_v45, %v2451_v15  ;;  %v2474_v39 = vpop.f32.mrb[10].mxu0  ;;  %v2496_v57 = vmax.f32 %v2425_v0, 1e-12 }
 0x113   :  { %3725 = vst [vmem:[#allocation29_spill] sm:$0xff] %v2467_v30  ;;  %3726 = vst [vmem:[#allocation30_spill] sm:$0xff] %v2474_v39  ;;  %1907 = vpow2.f32 %v756_v22  ;;  %v644_v40 = vmul.f32 %v2467_v30, %v2353_v17  ;;  %v742_v43 = vmul.f32 %v2269_v45, %v2459_v24  ;;  %v2482_v13 = vpop.f32.mrb[11].mxu0  ;;  %v2484_v4 = vpop.eup %1893  ;;  %v700_v22 = vmul.f32 %v2262_v42, %v683_v50 }
 0x114   :  { %3727 = vst [vmem:[#allocation31_spill] sm:$0xff] %v2482_v13  ;;  %1909 = vpow2.f32 %v717_v12  ;;  %v762_v5 = vmul.f32 1.442695, %v743_v34  ;;  %v2487_v9 = vmin.f32 %v645_v33, %v2267_v44  ;;  %v2489_v17 = vpop.f32.mrb[12].mxu1  ;;  %v2491_v10 = vpop.eup %1895  ;;  %3729 = vst [vmem:[#allocation33_spill] sm:$0xff] %v2496_v57  ;;  %v2504_v33 = vstv %s2418_s28 }
 0x115   :  { %v760_v62 = vmul.f32 1.442695, %v742_v43  ;;  %v2499_v12 = vmin.f32 %v644_v40, %v2267_v44  ;;  %v2501_v18 = vpop.f32.mrb[13].mxu1  ;;  %v2507_v34 = vstv %s2420_s29  ;;  %v719_v30 = vmul.f32 1.442695, %v697_v38  ;;  %v2511_v43 = vpop.eup %1897  ;;  %3741 = vst [vmem:[#allocation45_spill] sm:$0xff] %v2557_v56 }
 0x116   :  { %3728 = vst [vmem:[#allocation32_spill] sm:$0xff] %v2487_v9  ;;  %3731 = vst [vmem:[#allocation35_spill] sm:$0xff] %v2501_v18  ;;  %1911 = vpow2.f32 %v762_v5  ;;  %v2509_v13 = vpop.f32.mrb[12].mxu0  ;;  %v2514_v50 = vstv %s2431_s30  ;;  %v745_v39 = vmul.f32 %v2269_v45, %v2487_v9  ;;  %v682_v40 = vmin.f32 %v2496_v57, %v2258_v41  ;;  %v2522_v26 = vpop.eup %1899 }
 0x117   :  { %3730 = vst [vmem:[#allocation34_spill] sm:$0xff] %v2499_v12  ;;  %3732 = vst [vmem:[#allocation36_spill] sm:$0xff] %v2509_v13  ;;  %1913 = vpow2.f32 %v760_v62  ;;  %v2520_v20 = vpop.f32.mrb[13].mxu0  ;;  %v2528_v38 = vstv %s2441_s11  ;;  %v744_v5 = vmul.f32 %v2269_v45, %v2499_v12  ;;  %v2534_v62 = vpop.eup %1901  ;;  %v2536_v9 = vstv %s1316_s12 }
 0x118   :  { %3733 = vst [vmem:[#allocation37_spill] sm:$0xff] %v2520_v20  ;;  %1915 = vpow2.f32 %v715_v16  ;;  %v2532_v13 = vpop.f32.mrb[14].mxu1  ;;  %3735 = vst [vmem:[#allocation39_spill] sm:$0xff] %v2534_v62  ;;  %v725_v21 = vmul.f32 1.442695, %v700_v22  ;;  %v2539_v20 = vadd.s32 48, %v2243_v35  ;;  %v699_v22 = vmul.f32 %v2262_v42, %v682_v40 }
 0x119   :  { %3734 = vst [vmem:[#allocation38_spill] sm:$0xff] %v2532_v13  ;;  %1917 = vpow2.f32 %v721_v6  ;;  %v2541_v8 = vpop.f32.mrb[15].mxu1  ;;  %v2544_v0 = vadd.s32 72, %v2243_v35  ;;  %v2547_v16 = vadd.s32 64, %v2243_v35  ;;  %v2550_v12 = vadd.s32 88, %v2243_v35  ;;  %v2552_v13 = vpop.eup %1903 }
 0x11a   :  { %3736 = vst [vmem:[#allocation40_spill] sm:$0xff] %v2541_v8  ;;  %1919 = vpow2.f32 %v719_v30  ;;  %3740 = vst [vmem:[#allocation44_spill] sm:$0xff] %v2552_v13  ;;  %v766_v6 = vmul.f32 1.442695, %v745_v39  ;;  %v2563_v8 = vmul.f32 %v2534_v62, %v2388_v36  ;;  %v2576_v56 = vmax.f32 %v2454_v19, 1e-12 }
 0x11b   :  { %3737 = vst [vmem:[#allocation41_spill] sm:$0xff] %v2544_v0  ;;  %3738 = vst [vmem:[#allocation42_spill] sm:$0xff] %v2547_v16  ;;  %1921 = vrsqrt.f32 %v2463_v3  ;;  %v764_v16 = vmul.f32 1.442695, %v744_v5  ;;  %vm549_vm10 = vcmp.ne.s32.totalorder %v2539_v20, %v2249_v37  ;;  %vm573_vm6 = vcmp.lt.f32.partialorder %v2489_v17, %v2258_v41 }
 0x11c   :  { %3739 = vst [vmem:[#allocation43_spill] sm:$0xff] %v2550_v12  ;;  %v2559_v30 = vpop.eup %1905  ;;  %1923 = vrsqrt.f32 %v2496_v57  ;;  %v2567_v12 = vadd.s32 104, %v2243_v35  ;;  %3743 = vst [vmem:[#allocation47_spill] sm:$0xff] %v2576_v56  ;;  %v2586_v35 = vmul.f32 %v2552_v13, %v2404_v53  ;;  %v2593_v57 = vmul.f32 1.442695, %v699_v22 }
 0x11d   :  { %v2569_v47 = vpop.eup %1907  ;;  %v792_v39 = vmul.f32 %v2559_v30, %v2276_v48  ;;  %v827_v40 = vmul.f32 %v2559_v30, %v2288_v52  ;;  %1925 = vpow2.f32 %v725_v21  ;;  %vm582_vm12 = vmand %vm549_vm10, %vm566_vm9  ;;  %v3771_v31 = vld [vmem:[#allocation35_spill] sm:$0xff] }
 0x11e   :  { %3742 = vst [vmem:[#allocation46_spill] sm:$0xff] %v2567_v12  ;;  %v2578_v36 = vpop.eup %1909  ;;  %v791_v5 = vmul.f32 %v2569_v47, %v2276_v48  ;;  %v826_v62 = vmul.f32 %v2569_v47, %v2288_v52  ;;  %3745 = vst [vmem:[#allocation49_spill] sm:$0xff] %v2586_v35  ;;  %v2589_v12 = vmax.f32 %v2465_v25, 1e-12  ;;  %1927 = vpow2.f32 %v766_v6 }
 0x11f   :  { %3744 = vst [vmem:[#allocation48_spill] sm:$0xff] %v2578_v36  ;;  %v810_v21 = vadd.f32 %v2285_v51, %v792_v39  ;;  %v845_v19 = vadd.f32 %v2295_v55, %v827_v40  ;;  %3746 = vst [vmem:[#allocation50_spill] sm:$0xff] %v2593_v57  ;;  %1929 = vpow2.f32 %v764_v16  ;;  %vm572_vm10 = vcmp.lt.f32.partialorder %v3771_v31, %v2258_v41 }
 0x120   :  { %v2595_v36 = vpop.eup %1911  ;;  %v809_v3 = vadd.f32 %v2285_v51, %v791_v5  ;;  %v844_v18 = vadd.f32 %v2295_v55, %v826_v62 }
 0x121   :  { %v2601_v13 = vpop.eup %1913  ;;  %v861_v25 = vmul.f32 %v2559_v30, %v810_v21  ;;  %v895_v39 = vmul.f32 %v2559_v30, %v845_v19  ;;  %v794_v6 = vmul.f32 %v2595_v36, %v2276_v48  ;;  %v829_v22 = vmul.f32 %v2595_v36, %v2288_v52 }
 0x122   :  { %v2609_v40 = vpop.eup %1915  ;;  %v860_v62 = vmul.f32 %v2569_v47, %v809_v3  ;;  %v894_v16 = vmul.f32 %v2569_v47, %v844_v18  ;;  %v793_v5 = vmul.f32 %v2601_v13, %v2276_v48  ;;  %v828_v21 = vmul.f32 %v2601_v13, %v2288_v52 }
 0x123   :  { %3747 = vst [vmem:[#allocation51_spill] sm:$0xff] %v2609_v40  ;;  %v2617_v53 = vpop.eup %1917  ;;  %v879_v19 = vadd.f32 %v2311_v61, %v861_v25  ;;  %v913_v35 = vadd.f32 %v2321_v2, %v895_v39  ;;  %v812_v45 = vadd.f32 %v2285_v51, %v794_v6  ;;  %v847_v40 = vadd.f32 %v2295_v55, %v829_v22 }
 0x124   :  { %3748 = vst [vmem:[#allocation52_spill] sm:$0xff] %v2617_v53  ;;  %v2623_v42 = vpop.eup %1919  ;;  %v878_v3 = vadd.f32 %v2311_v61, %v860_v62  ;;  %v912_v18 = vadd.f32 %v2321_v2, %v894_v16  ;;  %v811_v56 = vadd.f32 %v2285_v51, %v793_v5  ;;  %v846_v0 = vadd.f32 %v2295_v55, %v828_v21 }
 0x125   :  { %3749 = vst [vmem:[#allocation53_spill] sm:$0xff] %v2623_v42  ;;  %v2629_v57 = vpop.eup %1921  ;;  %v929_v25 = vmul.f32 %v2559_v30, %v879_v19  ;;  %v963_v39 = vmul.f32 %v2559_v30, %v913_v35  ;;  %v863_v6 = vmul.f32 %v2595_v36, %v812_v45  ;;  %v897_v22 = vmul.f32 %v2595_v36, %v847_v40 }
 0x126   :  { %3750 = vst [vmem:[#allocation54_spill] sm:$0xff] %v2629_v57  ;;  %v2635_v53 = vpop.eup %1923  ;;  %v928_v62 = vmul.f32 %v2569_v47, %v878_v3  ;;  %v962_v16 = vmul.f32 %v2569_v47, %v912_v18  ;;  %v862_v5 = vmul.f32 %v2601_v13, %v811_v56  ;;  %v896_v21 = vmul.f32 %v2601_v13, %v846_v0  ;;  %v2651_v57 = vpop.f32.mrb[14].mxu0 }
 0x127   :  { %3751 = vst [vmem:[#allocation55_spill] sm:$0xff] %v2635_v53  ;;  %v2641_v42 = vpop.eup %1925  ;;  %v947_v19 = vadd.f32 %v2366_v23, %v929_v25  ;;  %v981_v35 = vadd.f32 %v2376_v28, %v963_v39  ;;  %v881_v45 = vadd.f32 %v2311_v61, %v863_v6  ;;  %v915_v40 = vadd.f32 %v2321_v2, %v897_v22 }
 0x128   :  { %3752 = vst [vmem:[#allocation56_spill] sm:$0xff] %v2641_v42  ;;  %v946_v53 = vadd.f32 %v2366_v23, %v928_v62  ;;  %v980_v3 = vadd.f32 %v2376_v28, %v962_v16  ;;  %v880_v18 = vadd.f32 %v2311_v61, %v862_v5  ;;  %v914_v56 = vadd.f32 %v2321_v2, %v896_v21  ;;  %v2653_v0 = vpop.eup %1927 }
 0x129   :  { %3753 = vst [vmem:[#allocation57_spill] sm:$0xff] %v2651_v57  ;;  %v997_v25 = vmul.f32 %v2559_v30, %v947_v19  ;;  %v1031_v39 = vmul.f32 %v2559_v30, %v981_v35  ;;  %v931_v6 = vmul.f32 %v2595_v36, %v881_v45  ;;  %v965_v22 = vmul.f32 %v2595_v36, %v915_v40  ;;  %v2659_v42 = vpop.eup %1929 }
 0x12a   :  { %v996_v62 = vmul.f32 %v2569_v47, %v946_v53  ;;  %v1030_v16 = vmul.f32 %v2569_v47, %v980_v3  ;;  %v930_v5 = vmul.f32 %v2601_v13, %v880_v18  ;;  %v964_v21 = vmul.f32 %v2601_v13, %v914_v56 }
 0x12b   :  { %v1015_v57 = vadd.f32 %v2379_v29, %v997_v25  ;;  %v1049_v19 = vadd.f32 %v2413_v59, %v1031_v39  ;;  %v949_v35 = vadd.f32 %v2366_v23, %v931_v6  ;;  %v983_v45 = vadd.f32 %v2376_v28, %v965_v22 }
 0x12c   :  { %v1014_v40 = vadd.f32 %v2379_v29, %v996_v62  ;;  %v1048_v1 = vadd.f32 %v2413_v59, %v1030_v16  ;;  %v948_v53 = vadd.f32 %v2366_v23, %v930_v5  ;;  %v982_v3 = vadd.f32 %v2376_v28, %v964_v21  ;;  %v2685_v28 = vpop.f32.mrb[15].mxu0 }
 0x12d   :  { %v1065_v18 = vmul.f32 %v2559_v30, %v1015_v57  ;;  %v1099_v56 = vmul.f32 %v2559_v30, %v1049_v19  ;;  %v999_v25 = vmul.f32 %v2595_v36, %v949_v35  ;;  %v1033_v39 = vmul.f32 %v2595_v36, %v983_v45  ;;  %3754 = vst [vmem:[#allocation58_spill] sm:$0xff] %v2685_v28 }
 0x12e   :  { %v1064_v6 = vmul.f32 %v2569_v47, %v1014_v40  ;;  %v1098_v22 = vmul.f32 %v2569_v47, %v1048_v1  ;;  %v998_v62 = vmul.f32 %v2601_v13, %v948_v53  ;;  %v1032_v16 = vmul.f32 %v2601_v13, %v982_v3 }
 0x12f   :  { %v1083_v5 = vadd.f32 %v2416_v60, %v1065_v18  ;;  %v1117_v21 = vadd.f32 %v2504_v33, %v1099_v56  ;;  %v1017_v57 = vadd.f32 %v2379_v29, %v999_v25  ;;  %v1051_v19 = vadd.f32 %v2413_v59, %v1033_v39 }
 0x130   :  { %v1082_v35 = vadd.f32 %v2416_v60, %v1064_v6  ;;  %v1116_v45 = vadd.f32 %v2504_v33, %v1098_v22  ;;  %v1016_v1 = vadd.f32 %v2379_v29, %v998_v62  ;;  %v1050_v40 = vadd.f32 %v2413_v59, %v1032_v16 }
 0x131   :  { %v1133_v53 = vmul.f32 %v2559_v30, %v1083_v5  ;;  %v1167_v3 = vmul.f32 %v2559_v30, %v1117_v21  ;;  %v1067_v18 = vmul.f32 %v2595_v36, %v1017_v57  ;;  %v1101_v56 = vmul.f32 %v2595_v36, %v1051_v19 }
 0x132   :  { %v1132_v25 = vmul.f32 %v2569_v47, %v1082_v35  ;;  %v1166_v39 = vmul.f32 %v2569_v47, %v1116_v45  ;;  %v1066_v6 = vmul.f32 %v2601_v13, %v1016_v1  ;;  %v1100_v22 = vmul.f32 %v2601_v13, %v1050_v40 }
 0x133   :  { %v1151_v62 = vadd.f32 %v2507_v34, %v1133_v53  ;;  %v1185_v16 = vadd.f32 %v2514_v50, %v1167_v3  ;;  %v1085_v5 = vadd.f32 %v2416_v60, %v1067_v18  ;;  %v1119_v21 = vadd.f32 %v2504_v33, %v1101_v56 }
 0x134   :  { %v1150_v57 = vadd.f32 %v2507_v34, %v1132_v25  ;;  %v1184_v19 = vadd.f32 %v2514_v50, %v1166_v39  ;;  %v1084_v35 = vadd.f32 %v2416_v60, %v1066_v6  ;;  %v1118_v45 = vadd.f32 %v2504_v33, %v1100_v22 }
 0x135   :  { %v1201_v1 = vmul.f32 %v2559_v30, %v1151_v62  ;;  %v1235_v40 = vmul.f32 %v2559_v30, %v1185_v16  ;;  %v1135_v53 = vmul.f32 %v2595_v36, %v1085_v5  ;;  %v1169_v3 = vmul.f32 %v2595_v36, %v1119_v21 }
 0x136   :  { %v1200_v18 = vmul.f32 %v2569_v47, %v1150_v57  ;;  %v1234_v56 = vmul.f32 %v2569_v47, %v1184_v19  ;;  %v1134_v25 = vmul.f32 %v2601_v13, %v1084_v35  ;;  %v1168_v39 = vmul.f32 %v2601_v13, %v1118_v45 }
 0x137   :  { %v1219_v6 = vadd.f32 %v2525_v14, %v1201_v1  ;;  %v1253_v22 = vadd.f32 %v2528_v38, %v1235_v40  ;;  %v1153_v62 = vadd.f32 %v2507_v34, %v1135_v53  ;;  %v1187_v30 = vadd.f32 %v2514_v50, %v1169_v3 }
 0x138   :  { %v1218_v16 = vadd.f32 %v2525_v14, %v1200_v18  ;;  %v1252_v5 = vadd.f32 %v2528_v38, %v1234_v56  ;;  %v1152_v21 = vadd.f32 %v2507_v34, %v1134_v25  ;;  %v1186_v47 = vadd.f32 %v2514_v50, %v1168_v39 }
 0x139   :  { %v1269_v57 = vmul.f32 %v2484_v4, %v1219_v6  ;;  %v1285_v19 = vmul.f32 %v2484_v4, %v1253_v22  ;;  %v1203_v35 = vmul.f32 %v2595_v36, %v1153_v62  ;;  %v1237_v45 = vmul.f32 %v2595_v36, %v1187_v30 }
 0x13a   :  { %v1268_v1 = vmul.f32 %v2491_v10, %v1218_v16  ;;  %v1284_v40 = vmul.f32 %v2491_v10, %v1252_v5  ;;  %v1202_v53 = vmul.f32 %v2601_v13, %v1152_v21  ;;  %v1236_v3 = vmul.f32 %v2601_v13, %v1186_v47 }
 0x13b   :  { %v2732_v18 = vmul.f32 %v1269_v57, %v2293_v54  ;;  %v1318_v56 = vmul.f32 %v1269_v57, %v2399_v46  ;;  %v1221_v25 = vadd.f32 %v2525_v14, %v1203_v35  ;;  %v1255_v4 = vadd.f32 %v2528_v38, %v1237_v45 }
 0x13c   :  { %v2738_v39 = vmul.f32 %v1268_v1, %v2307_v58  ;;  %v1317_v36 = vmul.f32 %v1268_v1, %v2423_v63  ;;  %v1220_v10 = vadd.f32 %v2525_v14, %v1202_v53  ;;  %v1254_v6 = vadd.f32 %v2528_v38, %v1236_v3 }
 0x13d   :  { %3755 = vst [vmem:[#allocation59_spill] sm:$0xff] %v2732_v18  ;;  %v1334_v22 = vsub.f32 %v1318_v56, %v1285_v19  ;;  %v1271_v13 = vmul.f32 %v2511_v43, %v1221_v25  ;;  %v1287_v62 = vmul.f32 %v2511_v43, %v1255_v4  ;;  %v796_v46 = vmul.f32 %v2653_v0, %v2276_v48  ;;  %v3781_v25 = vld [vmem:[#allocation54_spill] sm:$0xff] }
 0x13e   :  { %3756 = vst [vmem:[#allocation60_spill] sm:$0xff] %v2738_v39  ;;  %v1333_v30 = vsub.f32 %v1317_v36, %v1284_v40  ;;  %v1270_v5 = vmul.f32 %v2522_v26, %v1220_v10  ;;  %v1286_v63 = vmul.f32 %v2522_v26, %v1254_v6  ;;  %v831_v45 = vmul.f32 %v2653_v0, %v2288_v52 }
 0x13f   :  { %v1351_v21 = vmul.f32 %v2536_v9, %v1334_v22  ;;  %v2757_v43 = vmul.f32 %v1271_v13, %v2332_v7  ;;  %v1320_v47 = vmul.f32 %v1271_v13, %v2451_v15  ;;  %v814_v57 = vadd.f32 %v2285_v51, %v796_v46 }
 0x140   :  { %v1350_v19 = vmul.f32 %v2536_v9, %v1333_v30  ;;  %v2763_v35 = vmul.f32 %v1270_v5, %v2341_v11  ;;  %v1319_v26 = vmul.f32 %v1270_v5, %v2459_v24  ;;  %v684_v15 = vmin.f32 %v2589_v12, %v2258_v41 }
 0x141   :  { %3757 = vst [vmem:[#allocation61_spill] sm:$0xff] %v2757_v43  ;;  %v1367_v1 = vmul.f32 %v1351_v21, %v2293_v54  ;;  %v1336_v40 = vsub.f32 %v1320_v47, %v1287_v62  ;;  %v865_v53 = vmul.f32 %v2653_v0, %v814_v57  ;;  %v849_v4 = vadd.f32 %v2295_v55, %v831_v45  ;;  %v3786_v43 = vld [vmem:[#allocation33_spill] sm:$0xff] }
 0x142   :  { %3758 = vst [vmem:[#allocation62_spill] sm:$0xff] %v2763_v35  ;;  %v1366_v3 = vmul.f32 %v1350_v19, %v2307_v58  ;;  %v1335_v56 = vsub.f32 %v1319_v26, %v1286_v63  ;;  %v795_v10 = vmul.f32 %v2659_v42, %v2276_v48  ;;  %v830_v13 = vmul.f32 %v2659_v42, %v2288_v52 }
 0x143   :  { %v2777_v24 = vmul.f32 %v2373_v27, %v1367_v1  ;;  %v1353_v36 = vmul.f32 %v2536_v9, %v1336_v40  ;;  %v883_v54 = vadd.f32 %v2311_v61, %v865_v53  ;;  %v899_v22 = vmul.f32 %v2653_v0, %v849_v4  ;;  %v3765_v40 = vld [vmem:[#allocation41_spill] sm:$0xff] }
 0x144   :  { %v2784_v6 = vmul.f32 %v2384_v32, %v1366_v3  ;;  %v1352_v58 = vmul.f32 %v2536_v9, %v1335_v56  ;;  %v813_v46 = vadd.f32 %v2285_v51, %v795_v10  ;;  %v2795_v30 = vmin.f32 %v2563_v8, %v2267_v44  ;;  %v3762_v8 = vld [vmem:[#allocation22_spill] sm:$0xff]  ;;  %v3766_v3 = vld [vmem:[#allocation47_spill] sm:$0xff]  ;;  %v3768_v4 = vld [vmem:[#allocation13_spill] sm:$0xff] }
 0x145   :  { %3759 = vst [vmem:[#allocation63_spill] sm:$0xff] %v2777_v24  ;;  %v1369_v27 = vmul.f32 %v1353_v36, %v2332_v7  ;;  %v933_v62 = vmul.f32 %v2653_v0, %v883_v54  ;;  %v917_v63 = vadd.f32 %v2321_v2, %v899_v22  ;;  %v848_v21 = vadd.f32 %v2295_v55, %v830_v13  ;;  %v3769_v10 = vld [vmem:[#allocation17_spill] sm:$0xff]  ;;  %v3770_v13 = vld [vmem:[#allocation14_spill] sm:$0xff]  ;;  %v3791_v24 = vld [vmem:[#allocation43_spill] sm:$0xff] }
 0x146   :  { %3760 = vst [vmem:[#allocation64_spill] sm:$0xff] %v2784_v6  ;;  %v1368_v5 = vmul.f32 %v1352_v58, %v2341_v11  ;;  %v864_v57 = vmul.f32 %v2659_v42, %v813_v46  ;;  %v2808_v19 = vmax.f32 %v2489_v17, 1e-12  ;;  %v3764_v11 = vld [vmem:[#allocation50_spill] sm:$0xff]  ;;  %vm552_vm11 = vcmp.ne.s32.totalorder %v3765_v40, %v2249_v37  ;;  %v3787_v6 = vld [vmem:[#allocation55_spill] sm:$0xff] }
 0x147   :  { %v2803_v47 = vmul.f32 %v2410_v49, %v1369_v27  ;;  %v951_v7 = vadd.f32 %v2366_v23, %v933_v62  ;;  %v967_v45 = vmul.f32 %v2653_v0, %v917_v63  ;;  %1931 = vpow2.f32 %v3764_v11 }
 0x148   :  { %v2811_v26 = vmul.f32 %v3762_v8, %v1368_v5  ;;  %v898_v1 = vmul.f32 %v2659_v42, %v848_v21  ;;  %v882_v53 = vadd.f32 %v2311_v61, %v864_v57  ;;  %1933 = vrsqrt.f32 %v3766_v3  ;;  %v3774_v8 = vld [vmem:[#allocation19_spill] sm:$0xff] }
 0x149   :  { %3761 = vst [vmem:[#allocation65_spill] sm:$0xff] %v2803_v47  ;;  %v1001_v49 = vmul.f32 %v2653_v0, %v951_v7  ;;  %v3767_v56 = vmin.f32 %v3766_v3, %v2258_v41  ;;  %v985_v58 = vadd.f32 %v3769_v10, %v967_v45  ;;  %v747_v27 = vmul.f32 %v3770_v13, %v2795_v30  ;;  %v3773_v7 = vld [vmem:[#allocation18_spill] sm:$0xff] }
 0x14a   :  { %3763 = vst [vmem:[#allocation22_spill] sm:$0xff] %v2811_v26  ;;  %v916_v22 = vadd.f32 %v2321_v2, %v898_v1  ;;  %v932_v46 = vmul.f32 %v2659_v42, %v882_v53  ;;  %1935 = vrsqrt.f32 %v2589_v12  ;;  %v2841_v5 = vmax.f32 %v3771_v31, 1e-12 }
 0x14b   :  { %v702_v36 = vmul.f32 %v3768_v4, %v3767_v56  ;;  %v1019_v62 = vadd.f32 %v2379_v29, %v1001_v49  ;;  %v1035_v20 = vmul.f32 %v2653_v0, %v985_v58  ;;  %v770_v21 = vmul.f32 1.442695, %v747_v27  ;;  %v3775_v58 = vld [vmem:[#allocation21_spill] sm:$0xff] }
 0x14c   :  { %3772 = vst [vmem:[#allocation50_spill] sm:$0xff] %v2841_v5  ;;  %v966_v63 = vmul.f32 %v2659_v42, %v916_v22  ;;  %v2846_v57 = vsel %vm582_vm12, %v3773_v7, 0.0  ;;  %vm569_vm13 = vcmp.lt.f32.partialorder %v3774_v8, %v2258_v41  ;;  %v950_v11 = vadd.f32 %v2366_v23, %v932_v46  ;;  %v3777_v7 = vld [vmem:[#allocation42_spill] sm:$0xff] }
 0x14d   :  { %v1069_v45 = vmul.f32 %v2653_v0, %v1019_v62  ;;  %1937 = vrsqrt.f32 %v2808_v19  ;;  %v1053_v1 = vadd.f32 %v2413_v59, %v1035_v20  ;;  %v701_v53 = vmul.f32 %v3768_v4, %v684_v15  ;;  %v3776_v62 = vld [vmem:[#allocation49_spill] sm:$0xff]  ;;  %vm585_vm0 = vmand %vm552_vm11, %vm569_vm13 }
 0x14e   :  { %v984_v49 = vadd.f32 %v3769_v10, %v966_v63  ;;  %1939 = vpow2.f32 %v770_v21  ;;  %vm568_vm14 = vcmp.lt.f32.partialorder %v3775_v58, %v2258_v41  ;;  %v1000_v22 = vmul.f32 %v2659_v42, %v950_v11  ;;  %v3778_v11 = vld [vmem:[#allocation38_spill] sm:$0xff] }
 0x14f   :  { %v1087_v56 = vadd.f32 %v2416_v60, %v1069_v45  ;;  %v729_v27 = vmul.f32 1.442695, %v702_v36  ;;  %v2862_v46 = vmin.f32 %v3776_v62, %v2267_v44  ;;  %vm551_vm15 = vcmp.ne.s32.totalorder %v3777_v7, %v2249_v37 }
 0x150   :  { %v1103_v20 = vmul.f32 %v2653_v0, %v1053_v1  ;;  %v1034_v15 = vmul.f32 %v2659_v42, %v984_v49  ;;  %v687_v63 = vmin.f32 %v2808_v19, %v2258_v41  ;;  %1941 = vrsqrt.f32 %v2841_v5  ;;  %v3780_v1 = vld [vmem:[#allocation27_spill] sm:$0xff]  ;;  %vm584_vm4 = vmand %vm551_vm15, %vm568_vm14 }
 0x151   :  { %v1137_v21 = vmul.f32 %v2653_v0, %v1087_v56  ;;  %v1018_v36 = vadd.f32 %v2379_v29, %v1000_v22  ;;  %v746_v45 = vmul.f32 %v3770_v13, %v2862_v46  ;;  %v2876_v62 = vmax.f32 %v3778_v11, 1e-12  ;;  %v2878_v54 = vpop.eup %1931 }
 0x152   :  { %v649_v49 = vmul.f32 %v3781_v25, %v3780_v1  ;;  %v1121_v32 = vadd.f32 %v2504_v33, %v1103_v20  ;;  %v1052_v16 = vadd.f32 %v2413_v59, %v1034_v15  ;;  %v727_v26 = vmul.f32 1.442695, %v701_v53  ;;  %v2884_v47 = vpop.eup %1933  ;;  %v3784_v1 = vld [vmem:[#allocation40_spill] sm:$0xff] }
 0x153   :  { %3779 = vst [vmem:[#allocation41_spill] sm:$0xff] %v2876_v62  ;;  %3782 = vst [vmem:[#allocation47_spill] sm:$0xff] %v2884_v47  ;;  %v1155_v56 = vadd.f32 %v2507_v34, %v1137_v21  ;;  %v1068_v22 = vmul.f32 %v2659_v42, %v1018_v36  ;;  %v768_v35 = vmul.f32 1.442695, %v746_v45  ;;  %1943 = vrsqrt.f32 %v2876_v62 }
 0x154   :  { %v1171_v20 = vmul.f32 %v2653_v0, %v1121_v32  ;;  %v1102_v53 = vmul.f32 %v2659_v42, %v1052_v16  ;;  %1945 = vpow2.f32 %v729_v27  ;;  %v704_v15 = vmul.f32 %v3768_v4, %v687_v63  ;;  %v2898_v21 = vpop.eup %1935  ;;  %v3788_v27 = vld [vmem:[#allocation23_spill] sm:$0xff] }
 0x155   :  { %3783 = vst [vmem:[#allocation17_spill] sm:$0xff] %v2898_v21  ;;  %v1205_v36 = vmul.f32 %v2653_v0, %v1155_v56  ;;  %v1086_v45 = vadd.f32 %v2416_v60, %v1068_v22  ;;  %1947 = vpow2.f32 %v768_v35  ;;  %v2903_v8 = vmax.f32 %v3784_v1, 1e-12 }
 0x156   :  { %v1189_v40 = vadd.f32 %v2514_v50, %v1171_v20  ;;  %v2908_v32 = vmul.f32 %v3787_v6, %v3786_v43  ;;  %v1120_v16 = vadd.f32 %v2504_v33, %v1102_v53  ;;  %v2912_v63 = vsel %vm585_vm0, %v3788_v27, 0.0  ;;  %v3790_v27 = vld [vmem:[#allocation25_spill] sm:$0xff] }
 0x157   :  { %3785 = vst [vmem:[#allocation14_spill] sm:$0xff] %v2903_v8  ;;  %v2914_v4 = vpop.eup %1937  ;;  %v1223_v56 = vadd.f32 %v2525_v14, %v1205_v36  ;;  %v1136_v35 = vmul.f32 %v2659_v42, %v1086_v45  ;;  %v2920_v22 = vmul.f32 %v2884_v47, %v3766_v3  ;;  %1949 = vrsqrt.f32 %v2903_v8  ;;  %v3792_v3 = vld [vmem:[#allocation48_spill] sm:$0xff] }
 0x158   :  { %3789 = vst [vmem:[#allocation35_spill] sm:$0xff] %v2914_v4  ;;  %v2923_v20 = vpop.eup %1939  ;;  %v1239_v43 = vmul.f32 %v2653_v0, %v1189_v40  ;;  %v1170_v53 = vmul.f32 %v2659_v42, %v1120_v16  ;;  %vm571_vm1 = vcmp.lt.f32.partialorder %v3790_v27, %v2258_v41  ;;  %v2931_v36 = vmul.f32 %v2898_v21, %v2589_v12  ;;  %v3798_v21 = vld [vmem:[#allocation32_spill] sm:$0xff] }
 0x159   :  { %v733_v45 = vmul.f32 1.442695, %v704_v15  ;;  %vm554_vm2 = vcmp.ne.s32.totalorder %v3791_v24, %v2249_v37  ;;  %v1273_v39 = vmul.f32 %v3792_v3, %v1223_v56  ;;  %v1154_v18 = vadd.f32 %v2507_v34, %v1136_v35  ;;  %v3794_v15 = vld [vmem:[#allocation28_spill] sm:$0xff]  ;;  %v3795_v35 = vld [vmem:[#allocation45_spill] sm:$0xff] }
 0x15a   :  { %v798_v0 = vmul.f32 %v2923_v20, %v2276_v48  ;;  %v833_v40 = vmul.f32 %v2923_v20, %v2288_v52  ;;  %v2941_v16 = vpop.eup %1941  ;;  %v1257_v28 = vadd.f32 %v2528_v38, %v1239_v43  ;;  %v1188_v12 = vadd.f32 %v2514_v50, %v1170_v53  ;;  %v3796_v43 = vld [vmem:[#allocation15_spill] sm:$0xff]  ;;  %vm587_vm8 = vmand %vm554_vm2, %vm571_vm1 }
 0x15b   :  { %3793 = vst [vmem:[#allocation18_spill] sm:$0xff] %v2941_v16  ;;  %vm570_vm3 = vcmp.lt.f32.partialorder %v3794_v15, %v2258_v41  ;;  %1951 = vpow2.f32 %v727_v26  ;;  %v2949_v56 = vmul.f32 %v2914_v4, %v2808_v19  ;;  %vm553_vm5 = vcmp.ne.s32.totalorder %v3795_v35, %v2249_v37 }
 0x15c   :  { %v2960_v53 = vmul.f32 %v1273_v39, %v3796_v43  ;;  %v1322_v47 = vmul.f32 %v1273_v39, %v3798_v21  ;;  %v1204_v26 = vmul.f32 %v2659_v42, %v1154_v18  ;;  %v816_v19 = vadd.f32 %v2285_v51, %v798_v0  ;;  %v3800_v39 = vld [vmem:[#allocation24_spill] sm:$0xff]  ;;  %vm586_vm9 = vmand %vm553_vm5, %vm570_vm3 }
 0x15d   :  { %v1289_v4 = vmul.f32 %v3792_v3, %v1257_v28  ;;  %v1238_v58 = vmul.f32 %v2659_v42, %v1188_v12  ;;  %1953 = vpow2.f32 %v733_v45  ;;  %v851_v7 = vadd.f32 %v2295_v55, %v833_v40  ;;  %v2968_v6 = vpop.eup %1943  ;;  %v3803_v40 = vld [vmem:[#allocation51_spill] sm:$0xff] }
 0x15e   :  { %3797 = vst [vmem:[#allocation19_spill] sm:$0xff] %v2960_v53  ;;  %3799 = vst [vmem:[#allocation21_spill] sm:$0xff] %v2968_v6  ;;  %v1222_v1 = vadd.f32 %v2525_v14, %v1204_v26  ;;  %v867_v25 = vmul.f32 %v2923_v20, %v816_v19  ;;  %v2973_v11 = vmin.f32 %v649_v49, %v2267_v44  ;;  %v2976_v18 = vsel %vm584_vm4, %v3800_v39, 0.0  ;;  %v2978_v21 = vpop.eup %1945  ;;  %v3805_v26 = vld [vmem:[#allocation46_spill] sm:$0xff]  ;;  %v3807_v39 = vld [vmem:[#allocation16_spill] sm:$0xff] }
 0x15f   :  { %3801 = vst [vmem:[#allocation49_spill] sm:$0xff] %v2976_v18  ;;  %3802 = vst [vmem:[#allocation42_spill] sm:$0xff] %v2978_v21  ;;  %v1338_v28 = vsub.f32 %v1322_v47, %v1289_v4  ;;  %v1256_v42 = vadd.f32 %v2528_v38, %v1238_v58  ;;  %v901_v45 = vmul.f32 %v2923_v20, %v851_v7  ;;  %v2986_v0 = vpop.eup %1947  ;;  %vm2045_vm4 = vmmov 0  }
 0x160   :  { %v2984_v3 = vmul.f32 %v2941_v16, %v2841_v5  ;;  %v1272_v12 = vmul.f32 %v3803_v40, %v1222_v1  ;;  %v885_v49 = vadd.f32 %v2311_v61, %v867_v25  ;;  %v2994_v47 = vmul.f32 %v2968_v6, %v2876_v62  ;;  %v3809_v16 = vld [vmem:[#allocation34_spill] sm:$0xff] }
 0x161   :  { %v749_v4 = vmul.f32 %v3770_v13, %v2973_v11  ;;  %vm556_vm7 = vcmp.ne.s32.totalorder %v3805_v26, %v2249_v37  ;;  %v1355_v19 = vmul.f32 %v2536_v9, %v1338_v28  ;;  %v1288_v58 = vmul.f32 %v3803_v40, %v1256_v42  ;;  %v3005_v25 = vpop.eup %1949 }
 0x162   :  { %3804 = vst [vmem:[#allocation27_spill] sm:$0xff] %v2994_v47  ;;  %v919_v1 = vadd.f32 %v2321_v2, %v901_v45  ;;  %v797_v7 = vmul.f32 %v2986_v0, %v2276_v48  ;;  %3806 = vst [vmem:[#allocation33_spill] sm:$0xff] %v3005_v25  ;;  %v3008_v6 = vmul.f32 %v1272_v12, %v3807_v39 }
 0x163   :  { %v1321_v62 = vmul.f32 %v1272_v12, %v3809_v16  ;;  %v935_v5 = vmul.f32 %v2923_v20, %v885_v49  ;;  %v832_v47 = vmul.f32 %v2986_v0, %v2288_v52  ;;  %v1371_v28 = vmul.f32 %v1355_v19, %v3796_v43  ;;  %v3810_v49 = vld [vmem:[#allocation26_spill] sm:$0xff]  ;;  %vm589_vm11 = vmand %vm556_vm7, %vm573_vm6 }
 0x164   :  { %3808 = vst [vmem:[#allocation23_spill] sm:$0xff] %v3008_v6  ;;  %v969_v42 = vmul.f32 %v2923_v20, %v919_v1  ;;  %v815_v45 = vadd.f32 %v2285_v51, %v797_v7  ;;  %v3019_v40 = vmul.f32 %v3005_v25, %v2903_v8  ;;  %v774_v1 = vmul.f32 1.442695, %v749_v4 }
 0x165   :  { %v1337_v21 = vsub.f32 %v1321_v62, %v1288_v58  ;;  %v953_v16 = vadd.f32 %v2366_v23, %v935_v5  ;;  %v850_v12 = vadd.f32 %v2295_v55, %v832_v47  ;;  %v3031_v43 = vpop.eup %1951  ;;  %v3034_v19 = vmul.f32 %v3810_v49, %v1371_v28  ;;  %v3812_v28 = vld [vmem:[#allocation30_spill] sm:$0xff] }
 0x166   :  { %v987_v62 = vadd.f32 %v3769_v10, %v969_v42  ;;  %v866_v58 = vmul.f32 %v2986_v0, %v815_v45  ;;  %v3043_v24 = vmin.f32 %v2908_v32, %v2267_v44  ;;  %1955 = vpow2.f32 %v774_v1 }
 0x167   :  { %3811 = vst [vmem:[#allocation25_spill] sm:$0xff] %v3034_v19  ;;  %v1354_v5 = vmul.f32 %v2536_v9, %v1337_v21  ;;  %v1003_v47 = vmul.f32 %v2923_v20, %v953_v16  ;;  %v900_v27 = vmul.f32 %v2986_v0, %v850_v12  ;;  %v3051_v7 = vpop.eup %1953  ;;  %v3056_v42 = vsel %vm587_vm8, %v3812_v28, 0.0 }
 0x168   :  { %v1037_v4 = vmul.f32 %v2923_v20, %v987_v62  ;;  %v884_v21 = vadd.f32 %v2311_v61, %v866_v58  ;;  %v748_v35 = vmul.f32 %v3770_v13, %v3043_v24  ;;  %v3069_v49 = vmin.f32 %v2920_v22, %v2267_v44  ;;  %v3813_v62 = vld [vmem:[#allocation31_spill] sm:$0xff]  ;;  %v3814_v58 = vld [vmem:[#allocation29_spill] sm:$0xff] }
 0x169   :  { %v1370_v32 = vmul.f32 %v1354_v5, %v3807_v39  ;;  %v1021_v45 = vadd.f32 %v2379_v29, %v1003_v47  ;;  %v918_v15 = vadd.f32 %v2321_v2, %v900_v27  ;;  %v3072_v39 = vsel %vm586_vm9, %v3813_v62, 0.0  ;;  %v3816_v62 = vld [vmem:[#allocation36_spill] sm:$0xff] }
 0x16a   :  { %v1055_v16 = vadd.f32 %v2413_v59, %v1037_v4  ;;  %v934_v12 = vmul.f32 %v2986_v0, %v884_v21  ;;  %v772_v27 = vmul.f32 1.442695, %v748_v35  ;;  %v751_v21 = vmul.f32 %v3770_v13, %v3069_v49 }
 0x16b   :  { %v3075_v1 = vmul.f32 %v3814_v58, %v1370_v32  ;;  %v1071_v5 = vmul.f32 %v2923_v20, %v1021_v45  ;;  %v968_v47 = vmul.f32 %v2986_v0, %v918_v15  ;;  %v3085_v22 = vmin.f32 %v2931_v36, %v2267_v44 }
 0x16c   :  { %v1105_v4 = vmul.f32 %v2923_v20, %v1055_v16  ;;  %v952_v28 = vadd.f32 %v2366_v23, %v934_v12  ;;  %1957 = vpow2.f32 %v772_v27  ;;  %v778_v16 = vmul.f32 1.442695, %v751_v21 }
 0x16d   :  { %3815 = vst [vmem:[#allocation43_spill] sm:$0xff] %v3075_v1  ;;  %v1089_v45 = vadd.f32 %v2416_v60, %v1071_v5  ;;  %v986_v15 = vadd.f32 %v3769_v10, %v968_v47  ;;  %v750_v17 = vmul.f32 %v3770_v13, %v3085_v22  ;;  %v3104_v58 = vsel %vm589_vm11, %v3816_v62, 0.0 }
 0x16e   :  { %v1123_v35 = vadd.f32 %v2504_v33, %v1105_v4  ;;  %v1002_v36 = vmul.f32 %v2986_v0, %v952_v28  ;;  %v3108_v5 = vmin.f32 %v2949_v56, %v2267_v44  ;;  %1959 = vpow2.f32 %v778_v16 }
 0x16f   :  { %v1139_v12 = vmul.f32 %v2923_v20, %v1089_v45  ;;  %v1036_v26 = vmul.f32 %v2986_v0, %v986_v15  ;;  %v776_v4 = vmul.f32 1.442695, %v750_v17  ;;  %v3818_v15 = vld [vmem:[#allocation12_spill] sm:$0xff] }
 0x170   :  { %3817 = vst [vmem:[#allocation48_spill] sm:$0xff] %v3108_v5  ;;  %v1173_v47 = vmul.f32 %v2923_v20, %v1123_v35  ;;  %v1020_v27 = vadd.f32 %v2379_v29, %v1002_v36  ;;  %v753_v45 = vmul.f32 %v3770_v13, %v3108_v5  ;;  %v517_v62 = vadd.s32 96, %v3818_v15  ;;  %v3117_v32 = vpop.eup %1955 }
 0x171   :  { %v1157_v28 = vadd.f32 %v2507_v34, %v1139_v12  ;;  %v1054_v21 = vadd.f32 %v2413_v59, %v1036_v26  ;;  %1961 = vpow2.f32 %v776_v4  ;;  %v3123_v35 = vmin.f32 %v2984_v3, %v2267_v44 }
 0x172   :  { %v1191_v56 = vadd.f32 %v2514_v50, %v1173_v47  ;;  %v1070_v18 = vmul.f32 %v2986_v0, %v1020_v27  ;;  %v800_v17 = vmul.f32 %v3117_v32, %v2276_v48  ;;  %v835_v12 = vmul.f32 %v3117_v32, %v2288_v52 }
 0x173   :  { %v1207_v36 = vmul.f32 %v2923_v20, %v1157_v28  ;;  %v1104_v16 = vmul.f32 %v2986_v0, %v1054_v21  ;;  %v782_v27 = vmul.f32 1.442695, %v753_v45  ;;  %vm555_vm12 = vcmp.ne.s32.totalorder %v517_v62, %v2249_v37 }
 0x174   :  { %v1241_v26 = vmul.f32 %v2923_v20, %v1191_v56  ;;  %v1088_v47 = vadd.f32 %v2416_v60, %v1070_v18  ;;  %v818_v28 = vadd.f32 %v2285_v51, %v800_v17  ;;  %v853_v21 = vadd.f32 %v2295_v55, %v835_v12  ;;  %vm588_vm13 = vmand %vm555_vm12, %vm572_vm10  ;;  %v3819_v18 = vld [vmem:[#allocation37_spill] sm:$0xff]  ;;  %v3821_v56 = vld [vmem:[#allocation52_spill] sm:$0xff] }
 0x175   :  { %v1225_v3 = vadd.f32 %v2525_v14, %v1207_v36  ;;  %v1122_v4 = vadd.f32 %v2504_v33, %v1104_v16  ;;  %1963 = vpow2.f32 %v782_v27  ;;  %v3144_v45 = vsel %vm588_vm13, %v3819_v18, 0.0  ;;  %v3822_v18 = vld [vmem:[#allocation20_spill] sm:$0xff] }
 0x176   :  { %v1259_v25 = vadd.f32 %v2528_v38, %v1241_v26  ;;  %v1138_v20 = vmul.f32 %v2986_v0, %v1088_v47  ;;  %3820 = vst [vmem:[#allocation28_spill] sm:$0xff] %v3144_v45  ;;  %v3146_v62 = vpop.eup %1957  ;;  %v869_v17 = vmul.f32 %v3117_v32, %v818_v28  ;;  %v903_v12 = vmul.f32 %v3117_v32, %v853_v21 }
 0x177   :  { %v1275_v36 = vmul.f32 %v3821_v56, %v1225_v3  ;;  %v1172_v16 = vmul.f32 %v2986_v0, %v1122_v4  ;;  %v799_v47 = vmul.f32 %v3146_v62, %v2276_v48  ;;  %v834_v27 = vmul.f32 %v3146_v62, %v2288_v52 }
 0x178   :  { %v1291_v31 = vmul.f32 %v3821_v56, %v1259_v25  ;;  %v1156_v26 = vadd.f32 %v2507_v34, %v1138_v20  ;;  %v887_v28 = vadd.f32 %v2311_v61, %v869_v17  ;;  %v3164_v21 = vpop.eup %1959  ;;  %v921_v20 = vadd.f32 %v2321_v2, %v903_v12 }
 0x179   :  { %v3159_v45 = vmul.f32 %v1275_v36, %v3822_v18  ;;  %v1324_v3 = vmul.f32 %v1275_v36, %v2795_v30  ;;  %v1190_v4 = vadd.f32 %v2514_v50, %v1172_v16  ;;  %v817_v56 = vadd.f32 %v2285_v51, %v799_v47 }
 0x17a   :  { %v1206_v25 = vmul.f32 %v2986_v0, %v1156_v26  ;;  %v852_v8 = vadd.f32 %v2295_v55, %v834_v27  ;;  %v937_v6 = vmul.f32 %v3117_v32, %v887_v28  ;;  %v802_v30 = vmul.f32 %v3164_v21, %v2276_v48 }
 0x17b   :  { %v1340_v1 = vsub.f32 %v1324_v3, %v1291_v31  ;;  %v1240_v19 = vmul.f32 %v2986_v0, %v1190_v4  ;;  %v3174_v36 = vpop.eup %1961  ;;  %v971_v17 = vmul.f32 %v3117_v32, %v921_v20  ;;  %v868_v12 = vmul.f32 %v3146_v62, %v817_v56  ;;  %v3823_v3 = vld [vmem:[#allocation53_spill] sm:$0xff] }
 0x17c   :  { %v1224_v16 = vadd.f32 %v2525_v14, %v1206_v25  ;;  %v902_v26 = vmul.f32 %v3146_v62, %v852_v8  ;;  %v955_v0 = vadd.f32 %v2366_v23, %v937_v6  ;;  %v820_v27 = vadd.f32 %v2285_v51, %v802_v30 }
 0x17d   :  { %v1357_v47 = vmul.f32 %v2536_v9, %v1340_v1  ;;  %v1258_v31 = vadd.f32 %v2528_v38, %v1240_v19  ;;  %v989_v28 = vadd.f32 %v3769_v10, %v971_v17  ;;  %v886_v25 = vadd.f32 %v2311_v61, %v868_v12 }
 0x17e   :  { %v1274_v4 = vmul.f32 %v3823_v3, %v1224_v16  ;;  %v920_v20 = vadd.f32 %v2321_v2, %v902_v26  ;;  %v1005_v1 = vmul.f32 %v3117_v32, %v955_v0  ;;  %v837_v19 = vmul.f32 %v3164_v21, %v2288_v52  ;;  %v3824_v26 = vld [vmem:[#allocation39_spill] sm:$0xff] }
 0x17f   :  { %v1373_v56 = vmul.f32 %v1357_v47, %v3822_v18  ;;  %v1290_v8 = vmul.f32 %v3823_v3, %v1258_v31  ;;  %v3193_v6 = vpop.eup %1963  ;;  %v1039_v17 = vmul.f32 %v3117_v32, %v989_v28  ;;  %v936_v12 = vmul.f32 %v3146_v62, %v886_v25 }
 0x180   :  { %v3196_v30 = vmul.f32 %v1274_v4, %v2846_v57  ;;  %v1323_v16 = vmul.f32 %v1274_v4, %v2862_v46  ;;  %v1023_v47 = vadd.f32 %v2379_v29, %v1005_v1  ;;  %v970_v31 = vmul.f32 %v3146_v62, %v920_v20 }
 0x181   :  { %v3202_v18 = vmul.f32 %v3824_v26, %v1373_v56  ;;  %v855_v0 = vadd.f32 %v2295_v55, %v837_v19  ;;  %v1057_v5 = vadd.f32 %v2413_v59, %v1039_v17  ;;  %v954_v46 = vadd.f32 %v2366_v23, %v936_v12 }
 0x182   :  { %v1339_v3 = vsub.f32 %v1323_v16, %v1290_v8  ;;  %v1860_v53 = vpack.c.bf16 %v3159_v45, %v3196_v30  ;;  %v1073_v4 = vmul.f32 %v3117_v32, %v1023_v47  ;;  %v988_v28 = vadd.f32 %v3769_v10, %v970_v31 }
 0x183   :  { %v871_v25 = vmul.f32 %v3164_v21, %v820_v27  ;;  %v905_v56 = vmul.f32 %v3164_v21, %v855_v0  ;;  %v1107_v1 = vmul.f32 %v3117_v32, %v1057_v5  ;;  %v1004_v8 = vmul.f32 %v3146_v62, %v954_v46 }
 0x184   :  { %v1356_v20 = vmul.f32 %v2536_v9, %v1339_v3  ;;  %v801_v19 = vmul.f32 %v3174_v36, %v2276_v48  ;;  %v1091_v16 = vadd.f32 %v2416_v60, %v1073_v4  ;;  %v1038_v17 = vmul.f32 %v3146_v62, %v988_v28  ;;  %v3825_v28 = vld [vmem:[#allocation44_spill] sm:$0xff] }
 0x185   :  { %v889_v12 = vadd.f32 %v2311_v61, %v871_v25  ;;  %v923_v26 = vadd.f32 %v2321_v2, %v905_v56  ;;  %v1125_v47 = vadd.f32 %v2504_v33, %v1107_v1  ;;  %v1022_v31 = vadd.f32 %v2379_v29, %v1004_v8 }
 0x186   :  { %v1372_v27 = vmul.f32 %v1356_v20, %v2846_v57  ;;  %v819_v5 = vadd.f32 %v2285_v51, %v801_v19  ;;  %v1141_v0 = vmul.f32 %v3117_v32, %v1091_v16  ;;  %v1056_v3 = vadd.f32 %v2413_v59, %v1038_v17 }
 0x187   :  { %v939_v46 = vmul.f32 %v3164_v21, %v889_v12  ;;  %v973_v4 = vmul.f32 %v3164_v21, %v923_v26  ;;  %v1175_v56 = vmul.f32 %v3117_v32, %v1125_v47  ;;  %v1072_v57 = vmul.f32 %v3146_v62, %v1022_v31 }
 0x188   :  { %v3233_v25 = vmul.f32 %v3825_v28, %v1372_v27  ;;  %v836_v20 = vmul.f32 %v3174_v36, %v2288_v52  ;;  %v1159_v1 = vadd.f32 %v2507_v34, %v1141_v0  ;;  %v1106_v8 = vmul.f32 %v3146_v62, %v1056_v3 }
 0x189   :  { %v957_v19 = vadd.f32 %v2366_v23, %v939_v46  ;;  %v991_v16 = vadd.f32 %v3769_v10, %v973_v4  ;;  %v1193_v12 = vadd.f32 %v2514_v50, %v1175_v56  ;;  %v1090_v26 = vadd.f32 %v2416_v60, %v1072_v57 }
 0x18a   :  { %v854_v27 = vadd.f32 %v2295_v55, %v836_v20  ;;  %v1209_v47 = vmul.f32 %v3117_v32, %v1159_v1  ;;  %v1124_v31 = vadd.f32 %v2504_v33, %v1106_v8  ;;  %v870_v28 = vmul.f32 %v3174_v36, %v819_v5 }
 0x18b   :  { %v1007_v0 = vmul.f32 %v3164_v21, %v957_v19  ;;  %v1041_v3 = vmul.f32 %v3164_v21, %v991_v16  ;;  %v1243_v46 = vmul.f32 %v3117_v32, %v1193_v12  ;;  %v1140_v4 = vmul.f32 %v3146_v62, %v1090_v26  ;;  %v3826_v26 = vld [vmem:[#allocation56_spill] sm:$0xff] }
 0x18c   :  { %v904_v56 = vmul.f32 %v3174_v36, %v854_v27  ;;  %v1227_v57 = vadd.f32 %v2525_v14, %v1209_v47  ;;  %v1174_v20 = vmul.f32 %v3146_v62, %v1124_v31  ;;  %v888_v32 = vadd.f32 %v2311_v61, %v870_v28 }
 0x18d   :  { %v1025_v1 = vadd.f32 %v2379_v29, %v1007_v0  ;;  %v1059_v8 = vadd.f32 %v2413_v59, %v1041_v3  ;;  %v1261_v19 = vadd.f32 %v2528_v38, %v1243_v46  ;;  %v1158_v16 = vadd.f32 %v2507_v34, %v1140_v4 }
 0x18e   :  { %v922_v12 = vadd.f32 %v2321_v2, %v904_v56  ;;  %v1277_v5 = vmul.f32 %v3826_v26, %v1227_v57  ;;  %v1192_v27 = vadd.f32 %v2514_v50, %v1174_v20  ;;  %v938_v46 = vmul.f32 %v3174_v36, %v888_v32 }
 0x18f   :  { %v1075_v47 = vmul.f32 %v3164_v21, %v1025_v1  ;;  %v1109_v31 = vmul.f32 %v3164_v21, %v1059_v8  ;;  %v1293_v0 = vmul.f32 %v3826_v26, %v1261_v19  ;;  %v1208_v3 = vmul.f32 %v3146_v62, %v1158_v16 }
 0x190   :  { %v972_v4 = vmul.f32 %v3174_v36, %v922_v12  ;;  %v3273_v28 = vmul.f32 %v1277_v5, %v2912_v63  ;;  %v1326_v56 = vmul.f32 %v1277_v5, %v2973_v11  ;;  %v1242_v57 = vmul.f32 %v3146_v62, %v1192_v27 }
 0x191   :  { %v1093_v20 = vadd.f32 %v2416_v60, %v1075_v47  ;;  %v1226_v1 = vadd.f32 %v2525_v14, %v1208_v3  ;;  %v1127_v8 = vadd.f32 %v2504_v33, %v1109_v31  ;;  %v956_v19 = vadd.f32 %v2366_v23, %v938_v46 }
 0x192   :  { %v990_v16 = vadd.f32 %v3769_v10, %v972_v4  ;;  %v1342_v32 = vsub.f32 %v1326_v56, %v1293_v0  ;;  %v1260_v12 = vadd.f32 %v2528_v38, %v1242_v57  ;;  %v804_v11 = vmul.f32 %v3193_v6, %v2276_v48  ;;  %v3827_v4 = vld [vmem:[#allocation49_spill] sm:$0xff] }
 0x193   :  { %v1143_v26 = vmul.f32 %v3164_v21, %v1093_v20  ;;  %v1276_v62 = vmul.f32 %v2878_v54, %v1226_v1  ;;  %v1177_v5 = vmul.f32 %v3164_v21, %v1127_v8  ;;  %v1006_v27 = vmul.f32 %v3174_v36, %v956_v19  ;;  %v3828_v8 = vld [vmem:[#allocation38_spill] sm:$0xff] }
 0x194   :  { %v1040_v47 = vmul.f32 %v3174_v36, %v990_v16  ;;  %v1359_v31 = vmul.f32 %v2536_v9, %v1342_v32  ;;  %v1292_v3 = vmul.f32 %v2878_v54, %v1260_v12  ;;  %v822_v46 = vadd.f32 %v2285_v51, %v804_v11 }
 0x195   :  { %v1161_v0 = vadd.f32 %v2507_v34, %v1143_v26  ;;  %v3295_v56 = vmul.f32 %v1276_v62, %v3827_v4  ;;  %v1325_v57 = vmul.f32 %v1276_v62, %v3043_v24  ;;  %v1195_v20 = vadd.f32 %v2514_v50, %v1177_v5  ;;  %v3829_v62 = vld [vmem:[#allocation54_spill] sm:$0xff] }
 0x196   :  { %v1024_v1 = vadd.f32 %v2379_v29, %v1006_v27  ;;  %vm575_vm14 = vcmp.lt.f32.partialorder %v3828_v8, %v2258_v41  ;;  %v1375_v19 = vmul.f32 %v1359_v31, %v2912_v63  ;;  %v1058_v16 = vadd.f32 %v2413_v59, %v1040_v47  ;;  %v3830_v31 = vld [vmem:[#allocation40_spill] sm:$0xff] }
 0x197   :  { %v1211_v54 = vmul.f32 %v3164_v21, %v1161_v0  ;;  %v839_v32 = vmul.f32 %v3193_v6, %v2288_v52  ;;  %v1341_v12 = vsub.f32 %v1325_v57, %v1292_v3  ;;  %v1245_v26 = vmul.f32 %v3164_v21, %v1195_v20  ;;  %v3831_v20 = vld [vmem:[#allocation42_spill] sm:$0xff] }
 0x198   :  { %v1074_v11 = vmul.f32 %v3174_v36, %v1024_v1  ;;  %v3312_v5 = vmul.f32 %v3829_v62, %v1375_v19  ;;  %v1108_v27 = vmul.f32 %v3174_v36, %v1058_v16  ;;  %vm574_vm15 = vcmp.lt.f32.partialorder %v3830_v31, %v2258_v41 }
 0x199   :  { %v1229_v63 = vadd.f32 %v2525_v14, %v1211_v54  ;;  %v857_v47 = vadd.f32 %v2295_v55, %v839_v32  ;;  %v1358_v3 = vmul.f32 %v2536_v9, %v1341_v12  ;;  %v1263_v0 = vadd.f32 %v2528_v38, %v1245_v26 }
 0x19a   :  { %v1092_v21 = vadd.f32 %v2416_v60, %v1074_v11  ;;  %v873_v57 = vmul.f32 %v3193_v6, %v822_v46  ;;  %v1126_v19 = vadd.f32 %v2504_v33, %v1108_v27  ;;  %v752_v16 = vmul.f32 %v3770_v13, %v3123_v35 }
 0x19b   :  { %v1279_v1 = vmul.f32 %v3831_v20, %v1229_v63  ;;  %v907_v54 = vmul.f32 %v3193_v6, %v857_v47  ;;  %v1374_v32 = vmul.f32 %v1358_v3, %v3827_v4  ;;  %v1295_v62 = vmul.f32 %v3831_v20, %v1263_v0  ;;  %v3832_v47 = vld [vmem:[#allocation55_spill] sm:$0xff] }
 0x19c   :  { %v1142_v12 = vmul.f32 %v3174_v36, %v1092_v21  ;;  %v891_v26 = vadd.f32 %v2311_v61, %v873_v57  ;;  %v1176_v63 = vmul.f32 %v3174_v36, %v1126_v19  ;;  %v780_v0 = vmul.f32 1.442695, %v752_v16 }
 0x19d   :  { %v3333_v11 = vmul.f32 %v1279_v1, %v3056_v42  ;;  %v1328_v46 = vmul.f32 %v1279_v1, %v3069_v49  ;;  %v925_v27 = vadd.f32 %v2321_v2, %v907_v54  ;;  %v3339_v24 = vmul.f32 %v3832_v47, %v1374_v32  ;;  %v3834_v47 = vld [vmem:[#allocation57_spill] sm:$0xff] }
 0x19e   :  { %v1160_v4 = vadd.f32 %v2507_v34, %v1142_v12  ;;  %v941_v3 = vmul.f32 %v3193_v6, %v891_v26  ;;  %v1194_v57 = vadd.f32 %v2514_v50, %v1176_v63  ;;  %v520_v17 = vadd.s32 120, %v3818_v15  ;;  %v3833_v26 = vld [vmem:[#allocation27_spill] sm:$0xff] }
 0x19f   :  { %v1344_v21 = vsub.f32 %v1328_v46, %v1295_v62  ;;  %v975_v20 = vmul.f32 %v3193_v6, %v925_v27  ;;  %v1839_v49 = vpack.c.bf16 %v3312_v5, %v3339_v24  ;;  %1965 = vpow2.f32 %v780_v0 }
 0x1a0   :  { %v1210_v1 = vmul.f32 %v3174_v36, %v1160_v4  ;;  %v959_v19 = vadd.f32 %v2366_v23, %v941_v3  ;;  %v1244_v32 = vmul.f32 %v3174_v36, %v1194_v57  ;;  %vm558_vm0 = vcmp.ne.s32.totalorder %v520_v17, %v2249_v37 }
 0x1a1   :  { %v1361_v54 = vmul.f32 %v2536_v9, %v1344_v21  ;;  %v993_v16 = vadd.f32 %v3769_v10, %v975_v20  ;;  %vm591_vm1 = vmand %vm558_vm0, %vm575_vm14  ;;  %v3361_v46 = vmin.f32 %v3833_v26, %v2267_v44  ;;  %v519_v63 = vadd.s32 112, %v3818_v15  ;;  %v3835_v21 = vld [vmem:[#allocation47_spill] sm:$0xff] }
 0x1a2   :  { %v1228_v62 = vadd.f32 %v2525_v14, %v1210_v1  ;;  %v1009_v12 = vmul.f32 %v3193_v6, %v959_v19  ;;  %v1262_v27 = vadd.f32 %v2528_v38, %v1244_v32  ;;  %v3368_v4 = vsel %vm591_vm1, %v3834_v47, 0.0  ;;  %v3841_v47 = vld [vmem:[#allocation64_spill] sm:$0xff] }
 0x1a3   :  { %v1377_v36 = vmul.f32 %v1361_v54, %v3056_v42  ;;  %v1043_v17 = vmul.f32 %v3193_v6, %v993_v16  ;;  %v755_v0 = vmul.f32 %v3770_v13, %v3361_v46  ;;  %vm557_vm2 = vcmp.ne.s32.totalorder %v519_v63, %v2249_v37  ;;  %v3836_v16 = vld [vmem:[#allocation58_spill] sm:$0xff] }
 0x1a4   :  { %v1278_v3 = vmul.f32 %v3031_v43, %v1228_v62  ;;  %v1027_v8 = vadd.f32 %v2379_v29, %v1009_v12  ;;  %v1294_v42 = vmul.f32 %v3031_v43, %v1262_v27  ;;  %vm590_vm3 = vmand %vm557_vm2, %vm574_vm15  ;;  %v3385_v1 = vmin.f32 %v3019_v40, %v2267_v44  ;;  %v3838_v27 = vld [vmem:[#allocation60_spill] sm:$0xff]  ;;  %v3858_v44 = vld [vmem:[#allocation43_spill] sm:$0xff] }
 0x1a5   :  { %v3376_v57 = vmul.f32 %v3835_v21, %v1377_v36  ;;  %v1061_v20 = vadd.f32 %v2413_v59, %v1043_v17  ;;  %v786_v32 = vmul.f32 1.442695, %v755_v0  ;;  %v3394_v62 = vsel %vm590_vm3, %v3836_v16, 0.0  ;;  %v3837_v36 = vld [vmem:[#allocation59_spill] sm:$0xff] }
 0x1a6   :  { %v3388_v19 = vmul.f32 %v1278_v3, %v3072_v39  ;;  %v1327_v37 = vmul.f32 %v1278_v3, %v3085_v22  ;;  %v1077_v54 = vmul.f32 %v3193_v6, %v1027_v8  ;;  %v754_v31 = vmul.f32 %v3770_v13, %v3385_v1  ;;  %v3840_v13 = vld [vmem:[#allocation63_spill] sm:$0xff] }
 0x1a7   :  { %v1111_v43 = vmul.f32 %v3193_v6, %v1061_v20  ;;  %1967 = vpow2.f32 %v786_v32  ;;  %v2044_v26 = vmov 0.0|0.0   ;;  %v3839_v17 = vpack.c.bf16 %v3837_v36, %v3838_v27  ;;  %v3843_v32 = vld [vmem:[#allocation50_spill] sm:$0xff]  ;;  %v3844_v36 = vld [vmem:[#allocation17_spill] sm:$0xff] }
 0x1a8   :  { %v1343_v12 = vsub.f32 %v1327_v37, %v1294_v42  ;;  %v1095_v40 = vadd.f32 %v2416_v60, %v1077_v54  ;;  %1850 = vmatprep.subr.bf16.mxu1 %v2044_v26  ;;  %1826 = vmatprep.subr.bf16.mxu0 %v2044_v26  ;;  %v784_v63 = vmul.f32 1.442695, %v754_v31  ;;  %v3842_v3 = vpack.c.bf16 %v3840_v13, %v3841_v47 }
 0x1a9   :  { %v1129_v22 = vadd.f32 %v2504_v33, %v1111_v43  ;;  %1852 = vmatpush3.bf16.xpose.msra.mxu1 %v3839_v17  ;;  %v3410_v8 = vpop.eup %1965  ;;  %v2046_v54 = vmov 0.0   ;;  %v686_v43 = vmin.f32 %v3843_v32, %v2258_v41  ;;  %v3847_v32 = vld [vmem:[#allocation62_spill] sm:$0xff] }
 0x1aa   :  { %1828 = vmatpush3.bf16.xpose.msra.mxu0 %v3842_v3  ;;  %v1360_v0 = vmul.f32 %v2536_v9, %v1343_v12  ;;  %v1145_v21 = vmul.f32 %v3193_v6, %v1095_v40  ;;  %1853 = vmatprep.subr.bf16.mxu1 %v2044_v26  ;;  %v803_v20 = vmul.f32 %v3410_v8, %v2276_v48  ;;  %1969 = vpow2.f32 %v784_v63 }
 0x1ab   :  { %1829 = vmatprep.subr.bf16.mxu0 %v2044_v26  ;;  %v1179_v42 = vmul.f32 %v3193_v6, %v1129_v22  ;;  %v838_v37 = vmul.f32 %v3410_v8, %v2288_v52  ;;  %1788 = vmatprep.mubr.msk.f32.mxu0 %vm2045_vm4, %v2046_v54 }
 0x1ac   :  { %1823 = vmatprep.mubr.msk.f32.mxu1 %vm2045_vm4, %v2046_v54  ;;  %v1376_v16 = vmul.f32 %v1360_v0, %v3072_v39  ;;  %v1163_v31 = vadd.f32 %v2507_v34, %v1145_v21  ;;  %v821_v40 = vadd.f32 %v2285_v51, %v803_v20  ;;  %v3845_v39 = vld [vmem:[#allocation13_spill] sm:$0xff] }
 0x1ad   :  { %v1197_v12 = vadd.f32 %v2514_v50, %v1179_v42  ;;  %v856_v22 = vadd.f32 %v2295_v55, %v838_v37  ;;  %v703_v3 = vmul.f32 %v3845_v39, %v686_v43  ;;  %v3846_v54 = vld [vmem:[#allocation61_spill] sm:$0xff] }
 0x1ae   :  { %v3429_v27 = vmul.f32 %v3844_v36, %v1376_v16  ;;  %v1213_v63 = vmul.f32 %v3193_v6, %v1163_v31  ;;  %v872_v13 = vmul.f32 %v3410_v8, %v821_v40  ;;  %v3849_v16 = vld [vmem:[#allocation65_spill] sm:$0xff]  ;;  %v3850_v31 = vld [vmem:[#allocation22_spill] sm:$0xff] }
 0x1af   :  { %v1247_v17 = vmul.f32 %v3193_v6, %v1197_v12  ;;  %v906_v47 = vmul.f32 %v3410_v8, %v856_v22  ;;  %v3848_v6 = vpack.c.bf16 %v3846_v54, %v3847_v32  ;;  %v3851_v12 = vpack.c.bf16 %v3849_v16, %v3850_v31  ;;  %v3852_v22 = vld [vmem:[#allocation41_spill] sm:$0xff] }
 0x1b0   :  { %v1231_v21 = vadd.f32 %v2525_v14, %v1213_v63  ;;  %v890_v20 = vadd.f32 %v2311_v61, %v872_v13  ;;  %v689_v36 = vmin.f32 %v3852_v22, %v2258_v41  ;;  %v731_v31 = vmul.f32 1.442695, %v703_v3 }
 0x1b1   :  { %v1265_v42 = vadd.f32 %v2528_v38, %v1247_v17  ;;  %v924_v37 = vadd.f32 %v2321_v2, %v906_v47  ;;  %1855 = vmatpush3.bf16.xpose.msra.mxu1 %v3848_v6  ;;  %v3448_v43 = vpop.eup %1967 }
 0x1b2   :  { %1831 = vmatpush3.bf16.xpose.msra.mxu0 %v3851_v12  ;;  %v1281_v40 = vmul.f32 %v3051_v7, %v1231_v21  ;;  %1856 = vmatprep.subr.bf16.mxu1 %v2044_v26  ;;  %v940_v63 = vmul.f32 %v3410_v8, %v890_v20  ;;  %v806_v13 = vmul.f32 %v3448_v43, %v2276_v48  ;;  %v3853_v21 = vld [vmem:[#allocation48_spill] sm:$0xff]  ;;  %1971 = vpow2.f32 %v731_v31  ;;  %v3860_v31 = vld [vmem:[#allocation14_spill] sm:$0xff] }
 0x1b3   :  { %1832 = vmatprep.subr.bf16.mxu0 %v2044_v26  ;;  %v974_v17 = vmul.f32 %v3410_v8, %v924_v37  ;;  %v1297_v47 = vmul.f32 %v3051_v7, %v1265_v42  ;;  %v841_v6 = vmul.f32 %v3448_v43, %v2288_v52 }
 0x1b4   :  { %v3461_v54 = vmul.f32 %v1281_v40, %v3104_v58  ;;  %v1330_v32 = vmul.f32 %v1281_v40, %v3853_v21  ;;  %v3466_v16 = vpop.eup %1969  ;;  %v958_v20 = vadd.f32 %v2366_v23, %v940_v63  ;;  %v824_v12 = vadd.f32 %v2285_v51, %v806_v13 }
 0x1b5   :  { %v992_v37 = vadd.f32 %v3769_v10, %v974_v17  ;;  %v859_v7 = vadd.f32 %v2295_v55, %v841_v6  ;;  %v805_v42 = vmul.f32 %v3466_v16, %v2276_v48  ;;  %v840_v40 = vmul.f32 %v3466_v16, %v2288_v52  ;;  %v3854_v6 = vld [vmem:[#allocation19_spill] sm:$0xff] }
 0x1b6   :  { %v1346_v22 = vsub.f32 %v1330_v32, %v1297_v47  ;;  %v706_v21 = vmul.f32 %v3845_v39, %v689_v36  ;;  %v1008_v0 = vmul.f32 %v3410_v8, %v958_v20  ;;  %v875_v63 = vmul.f32 %v3448_v43, %v824_v12  ;;  %v3855_v20 = vld [vmem:[#allocation23_spill] sm:$0xff]  ;;  %v3857_v12 = vld [vmem:[#allocation25_spill] sm:$0xff] }
 0x1b7   :  { %v1042_v3 = vmul.f32 %v3410_v8, %v992_v37  ;;  %v909_v13 = vmul.f32 %v3448_v43, %v859_v7  ;;  %v823_v47 = vadd.f32 %v2285_v51, %v805_v42  ;;  %v858_v32 = vadd.f32 %v2295_v55, %v840_v40 }
 0x1b8   :  { %v1363_v17 = vmul.f32 %v2536_v9, %v1346_v22  ;;  %v1026_v48 = vadd.f32 %v2379_v29, %v1008_v0  ;;  %v893_v36 = vadd.f32 %v2311_v61, %v875_v63  ;;  %v3856_v37 = vpack.c.bf16 %v3854_v6, %v3855_v20 }
 0x1b9   :  { %v1060_v52 = vadd.f32 %v2413_v59, %v1042_v3  ;;  %v3859_v22 = vpack.c.bf16 %v3857_v12, %v3858_v44  ;;  %v927_v51 = vadd.f32 %v2321_v2, %v909_v13  ;;  %v874_v55 = vmul.f32 %v3466_v16, %v823_v47 }
 0x1ba   :  { %1858 = vmatpush3.bf16.xpose.msra.mxu1 %v3856_v37  ;;  %v1379_v7 = vmul.f32 %v1363_v17, %v3104_v58  ;;  %v908_v0 = vmul.f32 %v3466_v16, %v858_v32  ;;  %v688_v42 = vmin.f32 %v3860_v31, %v2258_v41  ;;  %v1076_v40 = vmul.f32 %v3410_v8, %v1026_v48  ;;  %v3861_v58 = vld [vmem:[#allocation35_spill] sm:$0xff] }
 0x1bb   :  { %1834 = vmatpush3.bf16.xpose.msra.mxu0 %v3859_v22  ;;  %1859 = vmatprep.subr.bf16.mxu1 %v2044_v26  ;;  %v1110_v3 = vmul.f32 %v3410_v8, %v1060_v52  ;;  %v943_v44 = vmul.f32 %v3448_v43, %v893_v36  ;;  %v977_v17 = vmul.f32 %v3448_v43, %v927_v51  ;;  %v737_v12 = vmul.f32 1.442695, %v706_v21 }
 0x1bc   :  { %1835 = vmatprep.subr.bf16.mxu0 %v2044_v26  ;;  %v3505_v63 = vmul.f32 %v3861_v58, %v1379_v7  ;;  %v892_v13 = vadd.f32 %v2311_v61, %v874_v55  ;;  %v926_v47 = vadd.f32 %v2321_v2, %v908_v0  ;;  %v1094_v32 = vadd.f32 %v2416_v60, %v1076_v40 }
 0x1bd   :  { %v1128_v41 = vadd.f32 %v2504_v33, %v1110_v3  ;;  %v961_v48 = vadd.f32 %v2366_v23, %v943_v44  ;;  %v995_v52 = vadd.f32 %v3769_v10, %v977_v17  ;;  %v705_v20 = vmul.f32 %v3845_v39, %v688_v42  ;;  %v1972_v42 = vpop.eup %1971 }
 0x1be   :  { %v942_v36 = vmul.f32 %v3466_v16, %v892_v13  ;;  %v976_v6 = vmul.f32 %v3466_v16, %v926_v47  ;;  %v1144_v37 = vmul.f32 %v3410_v8, %v1094_v32  ;;  %v3862_v39 = vpack.c.bf16 %v3202_v18, %v3233_v25 }
 0x1bf   :  { %v1178_v61 = vmul.f32 %v3410_v8, %v1128_v41  ;;  %v1011_v2 = vmul.f32 %v3448_v43, %v961_v48  ;;  %v1045_v22 = vmul.f32 %v3448_v43, %v995_v52  ;;  %v735_v40 = vmul.f32 1.442695, %v705_v20 }
 0x1c0   :  { %v960_v7 = vadd.f32 %v2366_v23, %v942_v36  ;;  %v994_v51 = vadd.f32 %v3769_v10, %v976_v6  ;;  %v1162_v55 = vadd.f32 %v2507_v34, %v1144_v37  ;;  %1973 = vpow2.f32 %v737_v12  ;;  %v3863_v36 = vld [vmem:[#allocation28_spill] sm:$0xff] }
 0x1c1   :  { %v1196_v0 = vadd.f32 %v2514_v50, %v1178_v61  ;;  %v1029_v31 = vadd.f32 %v2379_v29, %v1011_v2  ;;  %v1063_v21 = vadd.f32 %v2413_v59, %v1045_v22  ;;  %1975 = vpow2.f32 %v735_v40 }
 0x1c2   :  { %1861 = vmatpush3.bf16.xpose.msra.mxu1 %v1860_v53  ;;  %v1010_v23 = vmul.f32 %v3466_v16, %v960_v7  ;;  %v1044_v10 = vmul.f32 %v3466_v16, %v994_v51  ;;  %v1212_v3 = vmul.f32 %v3410_v8, %v1162_v55  ;;  %v3864_v61 = vpack.c.bf16 %v3273_v28, %v3295_v56 }
 0x1c3   :  { %1837 = vmatpush3.bf16.xpose.msra.mxu0 %v3862_v39  ;;  %1862 = vmatprep.subr.bf16.mxu1 %v2044_v26  ;;  %v1246_v53 = vmul.f32 %v3410_v8, %v1196_v0  ;;  %v1079_v45 = vmul.f32 %v3448_v43, %v1029_v31  ;;  %v1113_v30 = vmul.f32 %v3448_v43, %v1063_v21  ;;  %v3865_v21 = vld [vmem:[#allocation18_spill] sm:$0xff] }
 0x1c4   :  { %1838 = vmatprep.subr.bf16.mxu0 %v2044_v26  ;;  %v1028_v18 = vadd.f32 %v2379_v29, %v1010_v23  ;;  %v1062_v25 = vadd.f32 %v2413_v59, %v1044_v10  ;;  %v1230_v44 = vadd.f32 %v2525_v14, %v1212_v3  ;;  %v3866_v40 = vpack.c.bf16 %v3333_v11, %v3388_v19 }
 0x1c5   :  { %v1264_v58 = vadd.f32 %v2528_v38, %v1246_v53  ;;  %v1097_v17 = vadd.f32 %v2416_v60, %v1079_v45  ;;  %v1131_v13 = vadd.f32 %v2504_v33, %v1113_v30 }
 0x1c6   :  { %v1078_v47 = vmul.f32 %v3466_v16, %v1028_v18  ;;  %v1112_v8 = vmul.f32 %v3466_v16, %v1062_v25  ;;  %v1280_v32 = vmul.f32 %v1972_v42, %v1230_v44  ;;  %v3868_v18 = vld [vmem:[#allocation21_spill] sm:$0xff] }
 0x1c7   :  { %v1147_v41 = vmul.f32 %v3448_v43, %v1097_v17  ;;  %v1296_v48 = vmul.f32 %v1972_v42, %v1264_v58  ;;  %v1181_v29 = vmul.f32 %v3448_v43, %v1131_v13  ;;  %v3869_v44 = vld [vmem:[#allocation33_spill] sm:$0xff]  ;;  %v1544_v17 = vsub.s32 3, %v3818_v15 }
 0x1c8   :  { %v1096_v59 = vadd.f32 %v2416_v60, %v1078_v47  ;;  %v1130_v52 = vadd.f32 %v2504_v33, %v1112_v8  ;;  %v1312_v6 = vmul.f32 %v1280_v32, %v3863_v36  ;;  %v1329_v20 = vmul.f32 %v1280_v32, %v3123_v35 }
 0x1c9   :  { %v1165_v37 = vadd.f32 %v2507_v34, %v1147_v41  ;;  %v1199_v2 = vadd.f32 %v2514_v50, %v1181_v29 }
 0x1ca   :  { %1864 = vmatpush3.bf16.xpose.msra.mxu1 %v3864_v61  ;;  %v1146_v60 = vmul.f32 %v3466_v16, %v1096_v59  ;;  %v1180_v33 = vmul.f32 %v3466_v16, %v1130_v52  ;;  %v1345_v35 = vsub.f32 %v1329_v20, %v1296_v48  ;;  %v1869_v12 = vpack.c.bf16 %v3461_v54, %v1312_v6  ;;  %v1974_v7 = vpop.eup %1973 }
 0x1cb   :  { %1840 = vmatpush3.bf16.xpose.msra.mxu0 %v1839_v49  ;;  %1865 = vmatprep.subr.bf16.mxu1 %v2044_v26  ;;  %v1215_v28 = vmul.f32 %v3448_v43, %v1165_v37  ;;  %v1249_v56 = vmul.f32 %v3448_v43, %v1199_v2 }
 0x1cc   :  { %1841 = vmatprep.subr.bf16.mxu0 %v2044_v26  ;;  %v1164_v24 = vadd.f32 %v2507_v34, %v1146_v60  ;;  %v1198_v5 = vadd.f32 %v2514_v50, %v1180_v33  ;;  %v1362_v49 = vmul.f32 %v2536_v9, %v1345_v35  ;;  %v1976_v50 = vpop.eup %1975 }
 0x1cd   :  { %v1233_v22 = vadd.f32 %v2525_v14, %v1215_v28  ;;  %v1267_v51 = vadd.f32 %v2528_v38, %v1249_v56 }
 0x1ce   :  { %v1214_v55 = vmul.f32 %v3466_v16, %v1164_v24  ;;  %v1248_v0 = vmul.f32 %v3466_v16, %v1198_v5  ;;  %v1378_v54 = vmul.f32 %v1362_v49, %v3863_v36  ;;  %v3867_v16 = vpack.c.bf16 %v3376_v57, %v3429_v27 }
 0x1cf   :  { %v1283_v31 = vmul.f32 %v1974_v7, %v1233_v22  ;;  %v1299_v39 = vmul.f32 %v1974_v7, %v1267_v51 }
 0x1d0   :  { %v1232_v43 = vadd.f32 %v2525_v14, %v1214_v55  ;;  %v1266_v34 = vadd.f32 %v2528_v38, %v1248_v0  ;;  %v1394_v23 = vmul.f32 %v3865_v21, %v1378_v54 }
 0x1d1   :  { %v1315_v10 = vmul.f32 %v1283_v31, %v3368_v4  ;;  %v1332_v42 = vmul.f32 %v1283_v31, %v3361_v46 }
 0x1d2   :  { %1867 = vmatpush3.bf16.xpose.msra.mxu1 %v3866_v40  ;;  %v1282_v3 = vmul.f32 %v1976_v50, %v1232_v43  ;;  %v1845_v14 = vpack.c.bf16 %v3505_v63, %v1394_v23  ;;  %v1298_v53 = vmul.f32 %v1976_v50, %v1266_v34 }
 0x1d3   :  { %1843 = vmatpush3.bf16.xpose.msra.mxu0 %v3867_v16  ;;  %1868 = vmatprep.subr.bf16.mxu1 %v2044_v26  ;;  %v1348_v38 = vsub.f32 %v1332_v42, %v1299_v39 }
 0x1d4   :  { %1844 = vmatprep.subr.bf16.mxu0 %v2044_v26  ;;  %v1314_v45 = vmul.f32 %v1282_v3, %v3394_v62  ;;  %v1331_v46 = vmul.f32 %v1282_v3, %v3385_v1 }
 0x1d5   :  { %v1365_v11 = vmul.f32 %v2536_v9, %v1348_v38 }
 0x1d6   :  { %v1347_v19 = vsub.f32 %v1331_v46, %v1298_v53  ;;  %v1872_v30 = vpack.c.bf16 %v1315_v10, %v1314_v45 }
 0x1d7   :  { %v1381_v57 = vmul.f32 %v1365_v11, %v3368_v4  ;;  %v1398_v4 = vld [vmem:[%s3630_s3] sm:$0xf] }
 0x1d8   :  { %v1364_v27 = vmul.f32 %v2536_v9, %v1347_v19  ;;  %v1469_v9 = vld [vmem:[%s3630_s3 + $0x3] sm:$0x1]  ;;  %s2047_s3 = smov [#allocation8]  }
 0x1d9   :  { %v1397_v25 = vmul.f32 %v3868_v18, %v1381_v57  ;;  %s1575_s6 = sshll.u32 %s2047_s3, 4  ;;  %s1576_s6 = int_to_ptr.vmem [resolvable:$true] %s1575_s6 }
 0x1da   :  { %1870 = vmatpush3.bf16.xpose.msra.mxu1 %v1869_v12  ;;  %v1380_v63 = vmul.f32 %v1364_v27, %v3394_v62  ;;  %v1540_v62 = vld [vmem:[%s3631_s4] sm:$0x7]  ;;  %s2013_s4 = scalar_lea.vmem %s1576_s6, 64  ;;  %p2018_p2 = scmp.lt.s32.totalorder %s1576_s6, %s1576_s6 }
 0x1db   :  { %1846 = vmatpush3.bf16.xpose.msra.mxu0 %v1845_v14  ;;  %1871 = vmatprep.subr.bf16.mxu1 %v2044_v26  ;;  %v1541_v13 = vmul.f32 2.0, %v1540_v62  ;;  %p2014_p1 = scmp.ne.s32.totalorder %s1576_s6, %s2013_s4  ;;  %p2019_p3 = scmp.lt.s32.totalorder %s2013_s4, %s2013_s4 }
 0x1dc   :  { %1847 = vmatprep.subr.bf16.mxu0 %v2044_v26  ;;  %v1396_v1 = vmul.f32 %v3869_v44, %v1380_v63  ;;  %v1555_v26 = vld [vmem:[%s3632_s5] sm:$0x1] }
 0x1dd   :  { %v1556_v47 = vmul.f32 0.1062, %v1555_v26  ;;  %p2020_p4 = por %p2019_p3, %p2018_p2 }
 0x1de   :  { %v1848_v58 = vpack.c.bf16 %v1397_v25, %v1396_v1 }
 0x1df   :  { %p2021_p5 = pnand %p2020_p4, %p2014_p1 }
 0x1e2   :  { %1873 = vmatpush3.bf16.xpose.msra.mxu1 %v1872_v30 }
 0x1e3   :  { %1849 = vmatpush3.bf16.xpose.msra.mxu0 %v1848_v58 }
 0x1e9   :  { %1824 = vmatmul.mubr.f32.vlgmr.msra.gmra.mrb[16].mxu1 %v1469_v9 }
 0x1ea   :  { %1789 = vmatmul.mubr.f32.vlgmr.msra.gmra.mrb[16].mxu0 %v1398_v4 }
 0x2bc   :  { %v1536_v32 = vpop.f32.mrb[16].mxu1 }
 0x2bd   :  { %v1465_v8 = vpop.f32.mrb[16].mxu0  ;;  %v1549_v29 = vmul.f32 0.1062, %v1536_v32  ;;  %v1825_v59 = vpop.f32.mrb[17].mxu1 }
 0x2be   :  { %v1545_v41 = vrot.slane %v1465_v8, %v1544_v17  ;;  %v1790_v48 = vpop.f32.mrb[17].mxu0 }
 0x2bf   :  { %v1557_v36 = vadd.f32 %v1556_v47, %v1549_v29 }
 0x2c0   :  { %v1546_v52 = vmul.f32 %v1545_v41, %v1541_v13 }
 0x2c1   :  { %1558 = vst [vmem:[#allocation8 + $0x3] sm:$0x1] %v1557_v36 }
 0x2c2   :  { %v1547_v6 = vadd.f32 %v1546_v52, %v1465_v8 }
 0x2c4   :  { %v1548_v20 = vmul.f32 -0.1062, %v1547_v6 }
 0x2c6   :  { %1554 = vst [vmem:[#allocation8] sm:$0x7] %v1548_v20 }
 0x2c7   :  { %2024 = shalt.err (!%p2021_p5)
}
 0x2c8   :  { %s2025_s19 = scalar_lea.hbm %s3636_s9, 64 }
 0x2c9   :  { %p2026_p6 = scmp.ne.s32.totalorder %s3636_s9, %s2025_s19  ;;  %p2029_p7 = scmp.lt.u32.totalorder %s2025_s19, %s3636_s9 }
 0x2cb   :  { %p2031_p8 = pnand %p2029_p7, %p2026_p6 }
 0x2cd   :  { %2034 = shalt.err (!%p2031_p8)
}
 0x2ce   :  { %1578 = dma.vmem_to_hbm [thread:$0]  %s1576_s6, 64, %s3636_s9, [#allocation3]  }
 0x2cf   :  { %2039 = dma.done.wait [#allocation3], 64  }
 0x2d0   :  { %2040 = vsyncadd [#allocation3], 4294967232 }
 0x2d1   :  { %1582 = vsyncpa [#allocation3], 1 }
 0x2d2   :  { %1583 = vsyncpa [#allocation4], 1 }
 0x2d3   :  { %1584 = vsyncpa [#allocation6], 1 }

</bundles_post_ra>
